<compile_context>
chip_gen: v5e
topology: v5e:2x2
jax: 0.10.0
libtpu: 0.0.40
codegen_flags: <defaults>
</compile_context>

<pallas_src>
import jax
import jax.numpy as jnp
from jax import lax
from jax.experimental import pallas as pl
from jax.experimental.pallas import tpu as pltpu

block_sz = 64     # max sequence length (causal mask size)
n_embd = 384      # embedding dim
head_sz = 64      # head size for this example
dropout = 0.2     # unused in the eval-mode forward


def head_kernel(x_ref, w_ref, o_ref):
    # x_ref: (Bb, T, C) bf16 input tile
    # w_ref: (C, 3H) bf16 fused [q*scale | k | v] projection weights
    # o_ref: (Bb, T, H) output tile
    Bb, T, C = x_ref.shape
    H = o_ref.shape[-1]

    # Fused projection: one lane-dense (Bb*T, C) @ (C, 3H) MXU matmul, f32 acc.
    x2d = x_ref[...].reshape(Bb * T, C)                        # free leading-dim merge
    qkv = jnp.dot(x2d, w_ref[...],
                  preferred_element_type=jnp.float32)           # (Bb*T, 3H) f32
    qkv = qkv.reshape(Bb, T, 3 * H).astype(jnp.bfloat16)        # bf16 for the MXU

    q = qkv[:, :, 0 * H:1 * H]   # 1/sqrt(H) already folded into the weights
    k = qkv[:, :, 1 * H:2 * H]
    v = qkv[:, :, 2 * H:3 * H]

    # Batched QK^T: contract last axes directly (no materialized transpose).
    scores = jnp.einsum("bqd,bkd->bqk", q, k,
                        preferred_element_type=jnp.float32)     # (Bb, T, T) f32

    # Causal mask. Large finite negative -> exact zeros after softmax, and no
    # NaN risk if a row were ever fully masked (e.g. padded T).
    row = lax.broadcasted_iota(jnp.int32, (Bb, T, T), 1)
    col = lax.broadcasted_iota(jnp.int32, (Bb, T, T), 2)
    scores = jnp.where(col <= row, scores, jnp.float32(-1e30))

    # Numerically stable softmax in f32; approx reciprocal runs on the EUP.
    m = jnp.max(scores, axis=-1, keepdims=True)
    p = jnp.exp(scores - m)
    denom = jnp.sum(p, axis=-1, keepdims=True)
    probs = p * pl.reciprocal(denom, approx=True)               # (Bb, T, T) f32

    out = jnp.einsum("bqk,bkd->bqd", probs.astype(jnp.bfloat16), v,
                     preferred_element_type=jnp.float32)        # (Bb, T, H) f32
    o_ref[...] = out.astype(o_ref.dtype)


def head_forward(x, wk_t, wq_t, wv_t, batch_block=None):
    """Single-head causal self-attention (eval mode).

    x: (B, T, C) f32; wk_t/wq_t/wv_t: (C, H) transposed nn.Linear weights.
    Returns (B, T, H) in x.dtype.
    """
    B, T, C = x.shape
    H = wk_t.shape[1]
    assert T <= block_sz

    # Weight prep (done once per model in a real deployment): fold the
    # attention scale into W_q, fuse [q|k|v] into one (C, 3H) lane-dense
    # operand, cast to bf16 (native MXU input dtype).
    scale = jnp.float32(H) ** -0.5
    w_fused = jnp.concatenate([wq_t * scale, wk_t, wv_t], axis=1)
    w_fused = w_fused.astype(jnp.bfloat16)
    x_bf16 = x.astype(jnp.bfloat16)

    # Pick the per-step batch tile so Bb*T ~= 256 (fills the MXU M dimension on
    # v6e/v7x; two 128-passes on v5e) while keeping >=2 parallel grid steps
    # when the batch allows, so v7x can feed both TensorCores.
    if batch_block is None:
        target = max(1, 256 // T)
        divs = [d for d in range(1, B + 1) if B % d == 0 and d <= target]
        pref = [d for d in divs if B // d >= 2]
        batch_block = max(pref) if pref else max(divs)
    Bb = batch_block
    assert B % Bb == 0

    return pl.pallas_call(
        head_kernel,
        out_shape=jax.ShapeDtypeStruct((B, T, H), x.dtype),
        grid_spec=pltpu.PrefetchScalarGridSpec(
            num_scalar_prefetch=0,
            grid=(B // Bb,),
            in_specs=[
                pl.BlockSpec((Bb, T, C), lambda b: (b, 0, 0)),
                # Constant index_map: Pallas fetches the fused weights once and
                # keeps them resident across grid steps (no per-step re-DMA).
                pl.BlockSpec((C, 3 * H), lambda b: (0, 0)),
            ],
            out_specs=pl.BlockSpec((Bb, T, H), lambda b: (b, 0, 0)),
        ),
        compiler_params=pltpu.CompilerParams(
            dimension_semantics=("parallel",)),
    )(x_bf16, w_fused)


def head_reference(x, wk_t, wq_t, wv_t):
    """Pure-JAX f32 reference mirroring the PyTorch forward (eval mode)."""
    k = x @ wk_t
    q = x @ wq_t
    v = x @ wv_t
    W = q @ jnp.swapaxes(k, -2, -1) * (k.shape[-1] ** -0.5)
    T = x.shape[1]
    tril = jnp.tril(jnp.ones((T, T), dtype=bool))
    W = jnp.where(tril, W, -jnp.inf)
    W = jax.nn.softmax(W, axis=-1)
    return W @ v


if __name__ == "__main__":
    key = jax.random.PRNGKey(0)
    kx, kk, kq, kv = jax.random.split(key, 4)

    B, T, C, H = 8, block_sz, n_embd, head_sz
    x = jax.random.normal(kx, (B, T, C), dtype=jnp.float32)

    # Deterministic init of nn.Linear(n_embd, head_sz, bias=False) weights,
    # stored transposed as (C, H) for direct x @ W.
    bound = 1.0 / (C ** 0.5)
    wk_t = jax.random.uniform(kk, (C, H), jnp.float32, -bound, bound)
    wq_t = jax.random.uniform(kq, (C, H), jnp.float32, -bound, bound)
    wv_t = jax.random.uniform(kv, (C, H), jnp.float32, -bound, bound)

    out = jax.block_until_ready(head_forward(x, wk_t, wq_t, wv_t))
    ref = head_reference(x, wk_t, wq_t, wv_t)

    assert out.shape == (B, T, H)
    # bf16 matmul inputs + approx reciprocal => loosened tolerance vs f32 ref.
    max_err = float(jnp.max(jnp.abs(out - ref)))
    assert jnp.allclose(out, ref, atol=3e-2, rtol=3e-2), f"max_err={max_err}"

    print("KERNEL_OK")
</pallas_src>

<mosaic_0001>
module attributes {stable_mosaic.version = 11 : i64} {
  func.func @head_kernel(%arg0: i32, %arg1: memref<4x64x384xbf16, #tpu.memory_space<vmem>>, %arg2: memref<384x192xbf16, #tpu.memory_space<vmem>>, %arg3: memref<4x64x64xf32, #tpu.memory_space<vmem>>) attributes {dimension_semantics = [#tpu.dimension_semantics<parallel>], iteration_bounds = array<i64: 2>, scalar_prefetch = 0 : i64, scratch_operands = 0 : i64, tpu.core_type = #tpu.core_type<tc>, window_params = [{transform_indices = @transform_0, window_bounds = array<i64: 4, 64, 384>}, {pipeline_mode = #tpu.pipeline_mode<synchronous>, transform_indices = @transform_1, window_bounds = array<i64: 384, 192>}, {transform_indices = @transform_2, window_bounds = array<i64: 4, 64, 64>}]} {
    %c0 = arith.constant 0 : index
    %c0_0 = arith.constant 0 : index
    %c0_1 = arith.constant 0 : index
    %0 = vector.load %arg1[%c0, %c0_0, %c0_1] : memref<4x64x384xbf16, #tpu.memory_space<vmem>>, vector<4x64x384xbf16>
    %1 = vector.shape_cast %0 : vector<4x64x384xbf16> to vector<256x384xbf16>
    %c0_2 = arith.constant 0 : index
    %c0_3 = arith.constant 0 : index
    %2 = vector.load %arg2[%c0_2, %c0_3] : memref<384x192xbf16, #tpu.memory_space<vmem>>, vector<384x192xbf16>
    %cst = arith.constant dense<0.000000e+00> : vector<256x192xf32>
    %3 = tpu.matmul %1, %2, %cst {dimension_numbers = #tpu.dot_dimension_numbers<[1], [0], [0], [1], [0, 0, 1, 1], [], []>} : vector<256x384xbf16>, vector<384x192xbf16>, vector<256x192xf32> -> vector<256x192xf32>
    %4 = vector.shape_cast %3 : vector<256x192xf32> to vector<4x64x192xf32>
    %5 = arith.truncf %4 : vector<4x64x192xf32> to vector<4x64x192xbf16>
    %6 = vector.extract_strided_slice %5 {offsets = [0, 0, 0], sizes = [4, 64, 64], strides = [1, 1, 1]} : vector<4x64x192xbf16> to vector<4x64x64xbf16>
    %7 = vector.extract_strided_slice %5 {offsets = [0, 0, 64], sizes = [4, 64, 64], strides = [1, 1, 1]} : vector<4x64x192xbf16> to vector<4x64x64xbf16>
    %8 = vector.extract_strided_slice %5 {offsets = [0, 0, 128], sizes = [4, 64, 64], strides = [1, 1, 1]} : vector<4x64x192xbf16> to vector<4x64x64xbf16>
    "tpu.trace_start"() <{level = 10 : i32, message = "bqd,bkd->bqk"}> : () -> ()
    %cst_4 = arith.constant dense<0.000000e+00> : vector<4x64x64xf32>
    %9 = tpu.matmul %6, %7, %cst_4 {dimension_numbers = #tpu.dot_dimension_numbers<[2], [2], [1], [1], [0, 0, 0, 1, 1, 1], [0], [0]>} : vector<4x64x64xbf16>, vector<4x64x64xbf16>, vector<4x64x64xf32> -> vector<4x64x64xf32>
    "tpu.trace_stop"() : () -> ()
    %10 = tpu.iota {dimensions = array<i32: 1>} : vector<4x64x64xi32>
    %11 = tpu.iota {dimensions = array<i32: 2>} : vector<4x64x64xi32>
    %12 = arith.cmpi sle, %11, %10 : vector<4x64x64xi32>
    %cst_5 = arith.constant -1.000000e+30 : f32
    %13 = vector.broadcast %cst_5 : f32 to vector<4x64x64xf32>
    %14 = arith.select %12, %9, %13 : vector<4x64x64xi1>, vector<4x64x64xf32>
    %cst_6 = arith.constant dense<0xFF800000> : vector<4x64xf32>
    %15 = vector.multi_reduction <maximumf>, %14, %cst_6 [2] : vector<4x64x64xf32> to vector<4x64xf32>
    %16 = vector.shape_cast %15 : vector<4x64xf32> to vector<4x64x1xf32>
    %17 = vector.broadcast %16 : vector<4x64x1xf32> to vector<4x64x64xf32>
    %18 = arith.subf %14, %17 : vector<4x64x64xf32>
    %19 = math.exp %18 : vector<4x64x64xf32>
    %cst_7 = arith.constant dense<0.000000e+00> : vector<4x64xf32>
    %20 = vector.multi_reduction <add>, %19, %cst_7 [2] : vector<4x64x64xf32> to vector<4x64xf32>
    %21 = vector.shape_cast %20 : vector<4x64xf32> to vector<4x64x1xf32>
    %22 = tpu.reciprocal %21 {approx = true} : vector<4x64x1xf32> -> vector<4x64x1xf32>
    %23 = vector.broadcast %22 : vector<4x64x1xf32> to vector<4x64x64xf32>
    %24 = arith.mulf %19, %23 : vector<4x64x64xf32>
    %25 = arith.truncf %24 : vector<4x64x64xf32> to vector<4x64x64xbf16>
    "tpu.trace_start"() <{level = 10 : i32, message = "bqk,bkd->bqd"}> : () -> ()
    %cst_8 = arith.constant dense<0.000000e+00> : vector<4x64x64xf32>
    %26 = tpu.matmul %25, %8, %cst_8 {dimension_numbers = #tpu.dot_dimension_numbers<[2], [1], [1], [2], [0, 0, 0, 1, 1, 2], [0], [0]>} : vector<4x64x64xbf16>, vector<4x64x64xbf16>, vector<4x64x64xf32> -> vector<4x64x64xf32>
    "tpu.trace_stop"() : () -> ()
    %c0_9 = arith.constant 0 : index
    %c0_10 = arith.constant 0 : index
    %c0_11 = arith.constant 0 : index
    %27 = vector.load %arg3[%c0_9, %c0_10, %c0_11] : memref<4x64x64xf32, #tpu.memory_space<vmem>>, vector<4x64x64xf32>
    tpu.vector_store %arg3[%c0_9, %c0_10, %c0_11], %26 {strides = array<i32>} : memref<4x64x64xf32, #tpu.memory_space<vmem>>, vector<4x64x64xf32>,
    return
  }
  func.func @transform_0(%arg0: i32) -> (i32, i32, i32) {
    %c0_i32 = arith.constant 0 : i32
    %c0_i32_0 = arith.constant 0 : i32
    %c0_i32_1 = arith.constant 0 : i32
    return %arg0, %c0_i32, %c0_i32_0 : i32, i32, i32
  }
  func.func @transform_1(%arg0: i32) -> (i32, i32) {
    %c0_i32 = arith.constant 0 : i32
    %c0_i32_0 = arith.constant 0 : i32
    %c0_i32_1 = arith.constant 0 : i32
    return %c0_i32, %c0_i32_0 : i32, i32
  }
  func.func @transform_2(%arg0: i32) -> (i32, i32, i32) {
    %c0_i32 = arith.constant 0 : i32
    %c0_i32_0 = arith.constant 0 : i32
    %c0_i32_1 = arith.constant 0 : i32
    return %arg0, %c0_i32, %c0_i32_0 : i32, i32, i32
  }
}

</mosaic_0001>

<bundles_post_ra>
// kernel: tpu_custom_call.1
= control target key start
LH: loop header
LB: loop body
LE: loop exit
PB: predicated region body
PF: predicated region fallthrough
CT: control target
= control target key end

     0   :  { %7 = vsyncpa [#allocation3], 0  ;;  %s5022_s0 = inlined_call_operand.hbm [shape: bf16[8,64,384], index: 0, kind: input, shape index: {}]   ;;  %s5023_s1 = inlined_call_operand.vmem [shape: bf16[384,192], index: 1, kind: input, shape index: {}]   ;;  %s5024_s2 = inlined_call_operand.hbm [shape: f32[8,64,64], index: 2, kind: output, shape index: {}]  }
   0x1   :  { %9 = vsyncpa [#allocation3 + $0x1], 0 }
   0x2   :  { %10 = vsyncpa [#allocation4], 0 }
   0x3   :  { %12 = vsyncpa [#allocation4 + $0x1], 0  ;;  %s3392_s9 = smov 0   ;;  %s3394_s10 = smov 0  }
   0x4   :  { %s3396_s11 = smov 0   ;;  %s3398_s12 = smov 0  }
   0x5 LB: > { %s3413_s13 = sadd.s32 4294967295, %s3370_s12   ;;  %s2564_s14 = sadd.s32 4294967294, %s3370_s12   ;;  %s3370_s12 = sphi %s3398_s12, %s5102_s12   ;;  %s3366_s11 = sphi %s3396_s11, %s5101_s11   ;;  %s3362_s10 = sphi %s3394_s10, %s5100_s10   ;;  %s3358_s9 = sphi %s3392_s9, %s5099_s9  }
   0x6   : > { %s3417_s15 = sadd.s32 1, %s3370_s12   ;;  %s25_s16 = sadd.s32 1, %s3366_s11 }
   0x7   : > { %s22_s17 = ssub.s32 %s3370_s12, %s3417_s15  ;;  %p32_p0 = scmp.ne.s32.totalorder %s3366_s11, %s3362_s10 }
   0x8   : > { %p23_p1 = scmp.eq.s32.totalorder %s22_s17, 0  ;;  %p33_p2 = scmp.eq.s32.totalorder %s3370_s12, 0 }
   0x9   : > { %p38_p3 = scmp.ne.s32.totalorder %s3362_s10, %s3358_s9  ;;  %p39_p4 = scmp.eq.s32.totalorder %s3413_s13, 0 }
   0xa   : > { %s3429_s18 = scalar_select %p23_p1, %s3366_s11, %s25_s16  }
   0xb   : > { %p34_p5 = por %p33_p2, %p32_p0  ;;  %p3431_p6 = por %p39_p4, %p38_p3 }
   0xc   : > { %p83_p7 = scmp.eq.s32.totalorder %s3413_s13, 1  ;;  %p89_p8 = scmp.eq.s32.totalorder %s2564_s14, 1 }
   0xd   : > { %p2566_p9 = scmp.ge.s32.totalorder %s3370_s12, 2  ;;  %p3107_p10 = scmp.lt.s32.totalorder %s3370_s12, 2 }
   0xe   : > { %p3438_p11 = por %p83_p7, %p32_p0  ;;  %p3442_p12 = por %p89_p8, %p38_p3 }
   0xf   : > { %s112_s22 = sand.u32 1, %s3366_s11   ;;  %s3093_s23 = smul.u32 384, %s3370_s12 }
  0x10   : > { %s3092_s24 = smul.u32 384, %s112_s22  ;;  %p3451_p13 = pnand %p3107_p10, %p34_p5 }
  0x11   : > { %s122_s27 = scalar_lea.hbm %s5022_s0, %s3093_s23  ;;  %s113_s4 = scalar_lea.sflag [#allocation3], %s112_s22 }
  0x12   : > { %s123_s29 = sshll.u32 %s122_s27, 4  ;;  %s116_s30 = scalar_lea.vmem [#allocation2], %s3092_s24  ;;  %s124_s29 = int_to_ptr.hbm [resolvable:$true] %s123_s29 }
  0x13   : > { %s125_s3 = sshll.u32 %s116_s30, 4  ;;  %s3274_s5 = sshra.s32 %s124_s29, 4  ;;  %s126_s3 = int_to_ptr.vmem [resolvable:$true] %s125_s3  ;;  %s3275_s5 = int_to_ptr.hbm [resolvable:$true] %s3274_s5 }
  0x14   : > { %s3276_s6 = scalar_lea.hbm %s3275_s5, 384  ;;  %p3278_p1 = pneg %p3451_p13 }
  0x15   : > { %p3277_p0 = scmp.ne.s32.totalorder %s3275_s5, %s3276_s6  ;;  %s3281_s14 = scalar_lea.hbm %s5022_s0, 768 }
  0x16   : > { %p3282_p4 = scmp.lt.s32.totalorder %s3275_s5, %s5022_s0  ;;  %p3283_p5 = scmp.lt.s32.totalorder %s3281_s14, %s3276_s6 }
  0x17   : > { %p3279_p2 = pnand %p3278_p1, %p3277_p0 }
  0x18   : > { %p3284_p7 = por %p3283_p5, %p3282_p4 }
  0x19   : > { %p3280_p3 = pneg %p3279_p2 }
  0x1b   : > { %p3285_p8 = pnand %p3284_p7, %p3280_p3 }
  0x1d   : > { %3288 = shalt.err (!%p3285_p8)
}
  0x1e   : > { %s3372_s22 = smov 192   ;;  %s3373_s23 = smov 12  }
  0x1f   : > { %3102 = dma.hbm_to_vmem [thread:$0]  (!%p3451_p13), %s124_s29, 6144, %s126_s3, %s113_s4, %s3372_s22, %s3372_s22, %s3373_s23  }
  0x20   : > { %p2570_p10 = scmp.ge.s32.totalorder %s3370_s12, 1  ;;  %p133_p0 = scmp.lt.s32.totalorder %s3370_s12, 3 }
  0x22   : > { %p134_p1 = pnand %p2570_p10, %p133_p0 }
  0x24   : > { %137 = sbr.rel (%p134_p1) target bundleno = 1494 (0x5d6), region = 28 }
  0x29   : > { %s3468_s24 = sand.u32 1, %s3362_s10  }
  0x2a   : > { %s3094_s25 = smul.u32 384, %s3468_s24  ;;  %s140_s26 = scalar_lea.sflag [#allocation3], %s3468_s24 }
  0x2c   : > { %s3472_s27 = scalar_lea.vmem [#allocation2], %s3094_s25 }
  0x2d   : > { %3349 = dma.done.wait (%p3431_p6), %s140_s26, 6144  }
  0x2e   : > { %3351 = vsyncadd (%p3431_p6), %s140_s26, 4294961152  ;;  %v2822_v0 = vld [vmem:[%s5023_s1 + $0x70] sm:$0xf]  ;;  %v3057_v1 = vld [vmem:[%s5023_s1 + $0x74] sm:$0xf0]  ;;  %vm1370_vm0 = vcmask 523264  }
  0x2f   : > { %v2886_v2 = vld [vmem:[%s5023_s1 + $0xf0] sm:$0xf]  ;;  %v2823_v3 = vor.u32 %v3057_v1, %v2822_v0  ;;  %v3073_v4 = vld [vmem:[%s5023_s1 + $0xf4] sm:$0xf0]  ;;  %v2814_v9 = vld [vmem:[%s5023_s1 + $0x60] sm:$0xf] }
  0x30   : > { %v2950_v5 = vld [vmem:[%s5023_s1 + $0x170] sm:$0xf]  ;;  %v3089_v6 = vld [vmem:[%s5023_s1 + $0x174] sm:$0xf0]  ;;  %v2887_v7 = vor.u32 %v3073_v4, %v2886_v2  ;;  %v3055_v10 = vld [vmem:[%s5023_s1 + $0x64] sm:$0xf0] }
  0x31   : > { %v2951_v8 = vor.u32 %v3089_v6, %v2950_v5  ;;  %v2878_v11 = vld [vmem:[%s5023_s1 + $0xe0] sm:$0xf]  ;;  %776 = vmatpush.bf16.msra.mxu0 %v2823_v3  ;;  %v2815_v12 = vor.u32 %v3055_v10, %v2814_v9  ;;  %v3071_v13 = vld [vmem:[%s5023_s1 + $0xe4] sm:$0xf0]  ;;  %v2806_v18 = vld [vmem:[%s5023_s1 + $0x50] sm:$0xf] }
  0x32   : > { %v2942_v14 = vld [vmem:[%s5023_s1 + $0x160] sm:$0xf]  ;;  %v3087_v15 = vld [vmem:[%s5023_s1 + $0x164] sm:$0xf0]  ;;  %865 = vmatpush.bf16.msra.mxu1 %v2887_v7  ;;  %v2879_v16 = vor.u32 %v3071_v13, %v2878_v11  ;;  %v3053_v19 = vld [vmem:[%s5023_s1 + $0x54] sm:$0xf0] }
  0x33   : > { %954 = vmatpush.bf16.msra.mxu2 %v2951_v8  ;;  %v2943_v17 = vor.u32 %v3087_v15, %v2942_v14  ;;  %v2870_v20 = vld [vmem:[%s5023_s1 + $0xd0] sm:$0xf]  ;;  %v3069_v21 = vld [vmem:[%s5023_s1 + $0xd4] sm:$0xf0]  ;;  %v2807_v24 = vor.u32 %v3053_v19, %v2806_v18  ;;  %v2798_v27 = vld [vmem:[%s5023_s1 + $0x40] sm:$0xf] }
  0x34   : > { %v2934_v22 = vld [vmem:[%s5023_s1 + $0x150] sm:$0xf]  ;;  %v3085_v23 = vld [vmem:[%s5023_s1 + $0x154] sm:$0xf0]  ;;  %v2871_v25 = vor.u32 %v3069_v21, %v2870_v20  ;;  %v3051_v28 = vld [vmem:[%s5023_s1 + $0x44] sm:$0xf0] }
  0x35   : > { %777 = vmatpush.bf16.msra.mxu0 %v2815_v12  ;;  %v2935_v26 = vor.u32 %v3085_v23, %v2934_v22  ;;  %v2862_v29 = vld [vmem:[%s5023_s1 + $0xc0] sm:$0xf]  ;;  %v3067_v30 = vld [vmem:[%s5023_s1 + $0xc4] sm:$0xf0]  ;;  %v2799_v33 = vor.u32 %v3051_v28, %v2798_v27  ;;  %v2790_v36 = vld [vmem:[%s5023_s1 + $0x30] sm:$0xf] }
  0x36   : > { %866 = vmatpush.bf16.msra.mxu1 %v2879_v16  ;;  %v2926_v31 = vld [vmem:[%s5023_s1 + $0x140] sm:$0xf]  ;;  %v3083_v32 = vld [vmem:[%s5023_s1 + $0x144] sm:$0xf0]  ;;  %v2863_v34 = vor.u32 %v3067_v30, %v2862_v29  ;;  %v3049_v37 = vld [vmem:[%s5023_s1 + $0x34] sm:$0xf0] }
  0x37   : > { %955 = vmatpush.bf16.msra.mxu2 %v2943_v17  ;;  %v2927_v35 = vor.u32 %v3083_v32, %v2926_v31  ;;  %v2854_v38 = vld [vmem:[%s5023_s1 + $0xb0] sm:$0xf]  ;;  %v3065_v39 = vld [vmem:[%s5023_s1 + $0xb4] sm:$0xf0]  ;;  %v2791_v42 = vor.u32 %v3049_v37, %v2790_v36  ;;  %v2782_v45 = vld [vmem:[%s5023_s1 + $0x20] sm:$0xf] }
  0x38   : > { %v2918_v40 = vld [vmem:[%s5023_s1 + $0x130] sm:$0xf]  ;;  %v3081_v41 = vld [vmem:[%s5023_s1 + $0x134] sm:$0xf0]  ;;  %v2855_v43 = vor.u32 %v3065_v39, %v2854_v38  ;;  %v3047_v46 = vld [vmem:[%s5023_s1 + $0x24] sm:$0xf0] }
  0x39   : > { %778 = vmatpush.bf16.msra.mxu0 %v2807_v24  ;;  %v2919_v44 = vor.u32 %v3081_v41, %v2918_v40  ;;  %v2846_v47 = vld [vmem:[%s5023_s1 + $0xa0] sm:$0xf]  ;;  %v3063_v48 = vld [vmem:[%s5023_s1 + $0xa4] sm:$0xf0]  ;;  %v2783_v51 = vor.u32 %v3047_v46, %v2782_v45  ;;  %v2774_v54 = vld [vmem:[%s5023_s1 + $0x10] sm:$0xf] }
  0x3a   : > { %867 = vmatpush.bf16.msra.mxu1 %v2871_v25  ;;  %v2910_v49 = vld [vmem:[%s5023_s1 + $0x120] sm:$0xf]  ;;  %v3079_v50 = vld [vmem:[%s5023_s1 + $0x124] sm:$0xf0]  ;;  %v2847_v52 = vor.u32 %v3063_v48, %v2846_v47  ;;  %v3045_v55 = vld [vmem:[%s5023_s1 + $0x14] sm:$0xf0] }
  0x3b   : > { %956 = vmatpush.bf16.msra.mxu2 %v2935_v26  ;;  %v2911_v53 = vor.u32 %v3079_v50, %v2910_v49  ;;  %v2838_v56 = vld [vmem:[%s5023_s1 + $0x90] sm:$0xf]  ;;  %v3061_v57 = vld [vmem:[%s5023_s1 + $0x94] sm:$0xf0]  ;;  %v2775_v60 = vor.u32 %v3045_v55, %v2774_v54  ;;  %v2766_v63 = vld [vmem:[%s5023_s1] sm:$0xf] }
  0x3c   : > { %v2902_v58 = vld [vmem:[%s5023_s1 + $0x110] sm:$0xf]  ;;  %v3077_v59 = vld [vmem:[%s5023_s1 + $0x114] sm:$0xf0]  ;;  %v2839_v61 = vor.u32 %v3061_v57, %v2838_v56  ;;  %v3043_v0 = vld [vmem:[%s5023_s1 + $0x4] sm:$0xf0] }
  0x3d   : > { %779 = vmatpush.bf16.msra.mxu0 %v2799_v33  ;;  %v2903_v62 = vor.u32 %v3077_v59, %v2902_v58  ;;  %v2830_v1 = vld [vmem:[%s5023_s1 + $0x80] sm:$0xf]  ;;  %v3059_v2 = vld [vmem:[%s5023_s1 + $0x84] sm:$0xf0]  ;;  %v2767_v5 = vor.u32 %v3043_v0, %v2766_v63  ;;  %v2995_v7 = vld [vmem:[%s3472_s27 + $0x8] sm:$0xf0] }
  0x3e   : > { %868 = vmatpush.bf16.msra.mxu1 %v2863_v34  ;;  %v2894_v3 = vld [vmem:[%s5023_s1 + $0x100] sm:$0xf]  ;;  %v3075_v4 = vld [vmem:[%s5023_s1 + $0x104] sm:$0xf0]  ;;  %v2994_v8 = vld [vmem:[%s3472_s27 + $0x4] sm:$0xf]  ;;  %v2831_v9 = vor.u32 %v3059_v2, %v2830_v1 }
  0x3f   : > { %957 = vmatpush.bf16.msra.mxu2 %v2927_v35  ;;  %v2574_v6 = vld [vmem:[%s3472_s27] sm:$0xf]  ;;  %v2895_v10 = vor.u32 %v3075_v4, %v2894_v3  ;;  %v2576_v11 = vld [vmem:[%s3472_s27 + $0xc] sm:$0xf0]  ;;  %v2582_v12 = vld [vmem:[%s3472_s27 + $0x8] sm:$0xf] }
  0x40   : > { %v2996_v13 = vld [vmem:[%s3472_s27 + $0x10] sm:$0xf0]  ;;  %v3628_v14 = vor.u32 %v2995_v7, %v2574_v6  ;;  %v3630_v15 = vor.u32 %v2994_v8, %v2576_v11  ;;  %v2586_v17 = vld [vmem:[%s3472_s27 + $0x18] sm:$0xf]  ;;  %v2998_v18 = vld [vmem:[%s3472_s27 + $0x20] sm:$0xf0] }
  0x41   : > { %780 = vmatpush.bf16.msra.mxu0 %v2791_v42  ;;  %v3632_v16 = vor.u32 %v2996_v13, %v2582_v12  ;;  %v2997_v19 = vld [vmem:[%s3472_s27 + $0x1c] sm:$0xf]  ;;  %v2588_v20 = vld [vmem:[%s3472_s27 + $0x24] sm:$0xf0]  ;;  %v2594_v21 = vld [vmem:[%s3472_s27 + $0x20] sm:$0xf]  ;;  %v3643_v23 = vor.u32 %v2998_v18, %v2586_v17 }
  0x42   : > { %869 = vmatpush.bf16.msra.mxu1 %v2855_v43  ;;  %v2999_v22 = vld [vmem:[%s3472_s27 + $0x28] sm:$0xf0]  ;;  %v3645_v24 = vor.u32 %v2997_v19, %v2588_v20  ;;  %v2598_v26 = vld [vmem:[%s3472_s27 + $0x30] sm:$0xf]  ;;  %v3001_v27 = vld [vmem:[%s3472_s27 + $0x38] sm:$0xf0] }
  0x43   : > { %958 = vmatpush.bf16.msra.mxu2 %v2919_v44  ;;  %v3647_v25 = vor.u32 %v2999_v22, %v2594_v21  ;;  %v3000_v28 = vld [vmem:[%s3472_s27 + $0x34] sm:$0xf]  ;;  %v2600_v29 = vld [vmem:[%s3472_s27 + $0x3c] sm:$0xf0]  ;;  %v2606_v30 = vld [vmem:[%s3472_s27 + $0x38] sm:$0xf]  ;;  %v3658_v32 = vor.u32 %v3001_v27, %v2598_v26 }
  0x44   : > { %v3002_v31 = vld [vmem:[%s3472_s27 + $0x40] sm:$0xf0]  ;;  %v3660_v33 = vor.u32 %v3000_v28, %v2600_v29  ;;  %v2610_v35 = vld [vmem:[%s3472_s27 + $0x48] sm:$0xf]  ;;  %v3004_v36 = vld [vmem:[%s3472_s27 + $0x50] sm:$0xf0] }
  0x45   : > { %781 = vmatpush.bf16.msra.mxu0 %v2783_v51  ;;  %v3662_v34 = vor.u32 %v3002_v31, %v2606_v30  ;;  %v3003_v37 = vld [vmem:[%s3472_s27 + $0x4c] sm:$0xf]  ;;  %v2612_v38 = vld [vmem:[%s3472_s27 + $0x54] sm:$0xf0]  ;;  %v2618_v39 = vld [vmem:[%s3472_s27 + $0x50] sm:$0xf]  ;;  %v3673_v41 = vor.u32 %v3004_v36, %v2610_v35 }
  0x46   : > { %870 = vmatpush.bf16.msra.mxu1 %v2847_v52  ;;  %v3005_v40 = vld [vmem:[%s3472_s27 + $0x58] sm:$0xf0]  ;;  %v3675_v42 = vor.u32 %v3003_v37, %v2612_v38  ;;  %v2622_v44 = vld [vmem:[%s3472_s27 + $0x60] sm:$0xf]  ;;  %v3007_v45 = vld [vmem:[%s3472_s27 + $0x68] sm:$0xf0] }
  0x47   : > { %959 = vmatpush.bf16.msra.mxu2 %v2911_v53  ;;  %v3677_v43 = vor.u32 %v3005_v40, %v2618_v39  ;;  %v3006_v46 = vld [vmem:[%s3472_s27 + $0x64] sm:$0xf]  ;;  %v2624_v47 = vld [vmem:[%s3472_s27 + $0x6c] sm:$0xf0]  ;;  %v2630_v48 = vld [vmem:[%s3472_s27 + $0x68] sm:$0xf]  ;;  %v3688_v50 = vor.u32 %v3007_v45, %v2622_v44 }
  0x48   : > { %v3008_v49 = vld [vmem:[%s3472_s27 + $0x70] sm:$0xf0]  ;;  %v3690_v51 = vor.u32 %v3006_v46, %v2624_v47  ;;  %v2634_v53 = vld [vmem:[%s3472_s27 + $0x78] sm:$0xf]  ;;  %v3010_v54 = vld [vmem:[%s3472_s27 + $0x80] sm:$0xf0] }
  0x49   : > { %782 = vmatpush.bf16.msra.mxu0 %v2775_v60  ;;  %v3692_v52 = vor.u32 %v3008_v49, %v2630_v48  ;;  %v3009_v55 = vld [vmem:[%s3472_s27 + $0x7c] sm:$0xf]  ;;  %v2636_v56 = vld [vmem:[%s3472_s27 + $0x84] sm:$0xf0]  ;;  %v2642_v57 = vld [vmem:[%s3472_s27 + $0x80] sm:$0xf]  ;;  %v3703_v59 = vor.u32 %v3010_v54, %v2634_v53 }
  0x4a   : > { %871 = vmatpush.bf16.msra.mxu1 %v2839_v61  ;;  %v3011_v58 = vld [vmem:[%s3472_s27 + $0x88] sm:$0xf0]  ;;  %v3705_v60 = vor.u32 %v3009_v55, %v2636_v56  ;;  %v3013_v63 = vld [vmem:[%s3472_s27 + $0x98] sm:$0xf0]  ;;  %v3012_v0 = vld [vmem:[%s3472_s27 + $0x94] sm:$0xf] }
  0x4b   : > { %960 = vmatpush.bf16.msra.mxu2 %v2903_v62  ;;  %v3707_v61 = vor.u32 %v3011_v58, %v2642_v57  ;;  %v2646_v62 = vld [vmem:[%s3472_s27 + $0x90] sm:$0xf]  ;;  %v2648_v1 = vld [vmem:[%s3472_s27 + $0x9c] sm:$0xf0]  ;;  %v2654_v2 = vld [vmem:[%s3472_s27 + $0x98] sm:$0xf] }
  0x4c   : > { %v3014_v3 = vld [vmem:[%s3472_s27 + $0xa0] sm:$0xf0]  ;;  %v3718_v4 = vor.u32 %v3013_v63, %v2646_v62  ;;  %v2658_v7 = vld [vmem:[%s3472_s27 + $0xa8] sm:$0xf]  ;;  %v3016_v8 = vld [vmem:[%s3472_s27 + $0xb0] sm:$0xf0] }
  0x4d   : > { %783 = vmatpush.bf16.msra.mxu0 %v2767_v5  ;;  %v3720_v5 = vor.u32 %v3012_v0, %v2648_v1  ;;  %v3722_v6 = vor.u32 %v3014_v3, %v2654_v2  ;;  %v2666_v11 = vld [vmem:[%s3472_s27 + $0xb0] sm:$0xf]  ;;  %v3017_v12 = vld [vmem:[%s3472_s27 + $0xb8] sm:$0xf0]  ;;  %v3733_v13 = vor.u32 %v3016_v8, %v2658_v7  ;;  %v2670_v19 = vld [vmem:[%s3472_s27 + $0xc0] sm:$0xf] }
  0x4e   : > { %872 = vmatpush.bf16.msra.mxu1 %v2831_v9  ;;  %v3015_v9 = vld [vmem:[%s3472_s27 + $0xac] sm:$0xf]  ;;  %v3737_v18 = vor.u32 %v3017_v12, %v2666_v11  ;;  %v3018_v21 = vld [vmem:[%s3472_s27 + $0xc4] sm:$0xf]  ;;  %v2672_v22 = vld [vmem:[%s3472_s27 + $0xcc] sm:$0xf0] }
  0x4f   : > { %961 = vmatpush.bf16.msra.mxu2 %v2895_v10  ;;  %v2660_v10 = vld [vmem:[%s3472_s27 + $0xb4] sm:$0xf0]  ;;  %v3019_v20 = vld [vmem:[%s3472_s27 + $0xc8] sm:$0xf0]  ;;  %v2678_v26 = vld [vmem:[%s3472_s27 + $0xc8] sm:$0xf]  ;;  %v3750_v30 = vor.u32 %v3018_v21, %v2672_v22 }
  0x50   : > { %784 = vmatmul.bf16.vlgmr.msra.gmra.mxu0 %v3628_v14  ;;  %v3735_v17 = vor.u32 %v3015_v9, %v2660_v10  ;;  %v3020_v27 = vld [vmem:[%s3472_s27 + $0xd0] sm:$0xf0]  ;;  %v3748_v28 = vor.u32 %v3019_v20, %v2670_v19  ;;  %v2682_v45 = vld [vmem:[%s3472_s27 + $0xd8] sm:$0xf]  ;;  %v3022_v46 = vld [vmem:[%s3472_s27 + $0xe0] sm:$0xf0] }
  0x51   : > { %873 = vmatmul.bf16.vlgmr.msra.gmra.mxu1 %v3630_v15  ;;  %v3752_v31 = vor.u32 %v3020_v27, %v2678_v26  ;;  %v3021_v47 = vld [vmem:[%s3472_s27 + $0xdc] sm:$0xf]  ;;  %v2684_v48 = vld [vmem:[%s3472_s27 + $0xe4] sm:$0xf0]  ;;  %v2690_v49 = vld [vmem:[%s3472_s27 + $0xe0] sm:$0xf]  ;;  %v3765_v55 = vor.u32 %v3022_v46, %v2682_v45 }
  0x52   : > { %962 = vmatmul.bf16.vlgmr.msra.gmra.mxu2 %v3632_v16  ;;  %v3023_v53 = vld [vmem:[%s3472_s27 + $0xe8] sm:$0xf0]  ;;  %v3769_v58 = vor.u32 %v3021_v47, %v2684_v48  ;;  %v2694_v9 = vld [vmem:[%s3472_s27 + $0xf0] sm:$0xf]  ;;  %v3025_v10 = vld [vmem:[%s3472_s27 + $0xf8] sm:$0xf0] }
  0x53   : > { %v3771_v62 = vor.u32 %v3023_v53, %v2690_v49  ;;  %v3024_v11 = vld [vmem:[%s3472_s27 + $0xf4] sm:$0xf]  ;;  %v2696_v12 = vld [vmem:[%s3472_s27 + $0xfc] sm:$0xf0]  ;;  %v2702_v19 = vld [vmem:[%s3472_s27 + $0xf8] sm:$0xf]  ;;  %v3784_v22 = vor.u32 %v3025_v10, %v2694_v9 }
  0x54   : > { %v3026_v20 = vld [vmem:[%s3472_s27 + $0x100] sm:$0xf0]  ;;  %v2706_v47 = vld [vmem:[%s3472_s27 + $0x108] sm:$0xf]  ;;  %v3028_v48 = vld [vmem:[%s3472_s27 + $0x110] sm:$0xf0] }
  0x55   : > { %v3027_v49 = vld [vmem:[%s3472_s27 + $0x10c] sm:$0xf]  ;;  %v2708_v53 = vld [vmem:[%s3472_s27 + $0x114] sm:$0xf0]  ;;  %s2571_s5 = sshll.u32 %s3468_s24, 8  ;;  %s3091_s7 = sshll.u32 %s3413_s13, 8 }
  0x56   : > { %s4901_s6 = scalar_lea.vmem [#allocation5], %s2571_s5  ;;  %s2487_s14 = scalar_lea.hbm %s5024_s2, %s3091_s7 }
  0x57   : > { %s2488_s16 = sshll.u32 %s4901_s6, 4  ;;  %s2490_s17 = sshll.u32 %s2487_s14, 4  ;;  %s2489_s16 = int_to_ptr.vmem [resolvable:$true] %s2488_s16  ;;  %s2491_s17 = int_to_ptr.hbm [resolvable:$true] %s2490_s17 }
  0x58   : > { %s2475_s22 = scalar_lea.sflag [#allocation4], %s3468_s24  ;;  %s3318_s23 = sshra.s32 %s2491_s17, 4  ;;  %s3319_s23 = int_to_ptr.hbm [resolvable:$true] %s3318_s23 }
  0x59   : > { %s3320_s25 = scalar_lea.hbm %s3319_s23, 256  ;;  %s3324_s28 = scalar_lea.hbm %s5024_s2, 512 }
  0x5a   : > { %p3321_p6 = scmp.ne.s32.totalorder %s3319_s23, %s3320_s25  ;;  %p3325_p3 = scmp.lt.s32.totalorder %s3319_s23, %s5024_s2 }
  0x5b   : > { %p3326_p4 = scmp.lt.s32.totalorder %s3324_s28, %s3320_s25 }
  0x5c   : > { %p3322_p13 = pnand %p3321_p6, %p3438_p11 }
  0x5d   : > { %p3327_p5 = por %p3326_p4, %p3325_p3 }
  0x5e   : > { %p3323_p2 = pneg %p3322_p13 }
  0x60   : > { %789 = vmatmul.bf16.gmra.mxu0 %v3643_v23  ;;  %p3328_p7 = pnand %p3327_p5, %p3323_p2 }
  0x61   : > { %878 = vmatmul.bf16.gmra.mxu1 %v3645_v24 }
  0x62   : > { %967 = vmatmul.bf16.gmra.mxu2 %v3647_v25 }
  0x70   : > { %794 = vmatmul.bf16.gmra.mxu0 %v3658_v32 }
  0x71   : > { %883 = vmatmul.bf16.gmra.mxu1 %v3660_v33 }
  0x72   : > { %972 = vmatmul.bf16.gmra.mxu2 %v3662_v34 }
  0x80   : > { %799 = vmatmul.bf16.gmra.mxu0 %v3673_v41 }
  0x81   : > { %888 = vmatmul.bf16.gmra.mxu1 %v3675_v42 }
  0x82   : > { %977 = vmatmul.bf16.gmra.mxu2 %v3677_v43 }
  0x90   : > { %804 = vmatmul.bf16.gmra.mxu0 %v3688_v50 }
  0x91   : > { %893 = vmatmul.bf16.gmra.mxu1 %v3690_v51 }
  0x92   : > { %982 = vmatmul.bf16.gmra.mxu2 %v3692_v52 }
  0xa0   : > { %809 = vmatmul.bf16.gmra.mxu0 %v3703_v59 }
  0xa1   : > { %898 = vmatmul.bf16.gmra.mxu1 %v3705_v60 }
  0xa2   : > { %987 = vmatmul.bf16.gmra.mxu2 %v3707_v61 }
  0xb0   : > { %814 = vmatmul.bf16.gmra.mxu0 %v3718_v4 }
  0xb1   : > { %903 = vmatmul.bf16.gmra.mxu1 %v3720_v5 }
  0xb2   : > { %992 = vmatmul.bf16.gmra.mxu2 %v3722_v6 }
  0xc0   : > { %819 = vmatmul.bf16.gmra.mxu0 %v3733_v13 }
  0xc1   : > { %908 = vmatmul.bf16.gmra.mxu1 %v3735_v17 }
  0xc2   : > { %997 = vmatmul.bf16.gmra.mxu2 %v3737_v18 }
  0xcd   : > { %v785_v29 = vpop.f32.mrf.mxu0 }
  0xce   : > { %v874_v35 = vpop.f32.mrf.mxu1 }
  0xcf   : > { %v875_v36 = vadd.f32 %v874_v35, %v785_v29  ;;  %v3788_v29 = vor.u32 %v3024_v11, %v2696_v12  ;;  %v3790_v35 = vor.u32 %v3026_v20, %v2702_v19  ;;  %v3072_v11 = vld [vmem:[%s5023_s1 + $0xf4] sm:$0xf]  ;;  %v2888_v12 = vld [vmem:[%s5023_s1 + $0xf8] sm:$0xf0] }
  0xd0   : > { %824 = vmatmul.bf16.gmra.mxu0 %v3748_v28  ;;  %v3056_v19 = vld [vmem:[%s5023_s1 + $0x74] sm:$0xf]  ;;  %v2891_v20 = vor.u32 %v3072_v11, %v2888_v12  ;;  %v2720_v11 = vld [vmem:[%s3472_s27 + $0x12c] sm:$0xf0]  ;;  %v2726_v12 = vld [vmem:[%s3472_s27 + $0x128] sm:$0xf] }
  0xd1   : > { %913 = vmatmul.bf16.gmra.mxu1 %v3750_v30 }
  0xd2   : > { %1002 = vmatmul.bf16.gmra.mxu2 %v3752_v31  ;;  %1132 = vmatpush.bf16.msrb.mxu0 %v2891_v20 }
  0xd5   : > { %v963_v37 = vpop.f32.mrf.mxu2  ;;  %v787_v39 = vpop.f32.mrf.mxu0 }
  0xd6   : > { %v3757_v38 = vadd.f32 %v963_v37, %v875_v36  ;;  %v876_v40 = vpop.f32.mrf.mxu1 }
  0xd7   : > { %v877_v44 = vadd.f32 %v876_v40, %v787_v39 }
  0xdd   : > { %v965_v54 = vpop.f32.mrf.mxu2  ;;  %v790_v57 = vpop.f32.mrf.mxu0 }
  0xde   : > { %v3767_v56 = vadd.f32 %v965_v54, %v877_v44  ;;  %v879_v63 = vpop.f32.mrf.mxu1  ;;  %v2714_v54 = vld [vmem:[%s3472_s27 + $0x110] sm:$0xf] }
  0xdf   : > { %v880_v0 = vadd.f32 %v879_v63, %v790_v57  ;;  %v3029_v57 = vld [vmem:[%s3472_s27 + $0x118] sm:$0xf0] }
  0xe0   : > { %829 = vmatmul.bf16.gmra.mxu0 %v3765_v55 }
  0xe1   : > { %918 = vmatmul.bf16.gmra.mxu1 %v3769_v58 }
  0xe2   : > { %1007 = vmatmul.bf16.gmra.mxu2 %v3771_v62 }
  0xe5   : > { %v968_v1 = vpop.f32.mrf.mxu2  ;;  %v792_v3 = vpop.f32.mrf.mxu0 }
  0xe6   : > { %v3776_v2 = vadd.f32 %v968_v1, %v880_v0  ;;  %v881_v7 = vpop.f32.mrf.mxu1  ;;  %v3803_v0 = vor.u32 %v3028_v48, %v2706_v47 }
  0xe7   : > { %v882_v8 = vadd.f32 %v881_v7, %v792_v3  ;;  %v3807_v7 = vor.u32 %v3027_v49, %v2708_v53  ;;  %v2816_v49 = vld [vmem:[%s5023_s1 + $0x68] sm:$0xf0] }
  0xed   : > { %v970_v21 = vpop.f32.mrf.mxu2  ;;  %v795_v27 = vpop.f32.mrf.mxu0 }
  0xee   : > { %v3786_v26 = vadd.f32 %v970_v21, %v882_v8  ;;  %v884_v36 = vpop.f32.mrf.mxu1  ;;  %v3809_v8 = vor.u32 %v3029_v57, %v2714_v54  ;;  %v2824_v21 = vld [vmem:[%s5023_s1 + $0x78] sm:$0xf0]  ;;  %v2718_v57 = vld [vmem:[%s3472_s27 + $0x120] sm:$0xf] }
  0xef   : > { %v885_v37 = vadd.f32 %v884_v36, %v795_v27  ;;  %v2827_v27 = vor.u32 %v3056_v19, %v2824_v21  ;;  %v3032_v19 = vld [vmem:[%s3472_s27 + $0x130] sm:$0xf0] }
  0xf0   : > { %834 = vmatmul.bf16.gmra.mxu0 %v3784_v22 }
  0xf1   : > { %923 = vmatmul.bf16.gmra.mxu1 %v3788_v29  ;;  %1043 = vmatpush.bf16.msra.mxu3 %v2827_v27 }
  0xf2   : > { %1012 = vmatmul.bf16.gmra.mxu2 %v3790_v35 }
  0xf5   : > { %v973_v39 = vpop.f32.mrf.mxu2  ;;  %v797_v44 = vpop.f32.mrf.mxu0 }
  0xf6   : > { %v3795_v40 = vadd.f32 %v973_v39, %v885_v37  ;;  %v886_v45 = vpop.f32.mrf.mxu1 }
  0xf7   : > { %v887_v46 = vadd.f32 %v886_v45, %v797_v44  ;;  %v3088_v44 = vld [vmem:[%s5023_s1 + $0x174] sm:$0xf]  ;;  %v2952_v45 = vld [vmem:[%s5023_s1 + $0x178] sm:$0xf0] }
  0xf8   : > { %v2955_v48 = vor.u32 %v3088_v44, %v2952_v45  ;;  %v3858_v45 = vor.u32 %v3032_v19, %v2726_v12  ;;  %v2944_v19 = vld [vmem:[%s5023_s1 + $0x168] sm:$0xf0] }
  0xfa   : > { %1221 = vmatpush.bf16.msrb.mxu1 %v2955_v48  ;;  %5036 = vst [vmem:[#allocation9_spill] sm:$0xff] %v3858_v45 }
  0xfd   : > { %v975_v63 = vpop.f32.mrf.mxu2  ;;  %v800_v3 = vpop.f32.mrf.mxu0 }
  0xfe   : > { %v3805_v1 = vadd.f32 %v975_v63, %v887_v46  ;;  %v889_v9 = vpop.f32.mrf.mxu1  ;;  %v3054_v46 = vld [vmem:[%s5023_s1 + $0x64] sm:$0xf]  ;;  %v3031_v63 = vld [vmem:[%s3472_s27 + $0x128] sm:$0xf0] }
  0xff   : > { %v890_v10 = vadd.f32 %v889_v9, %v800_v3  ;;  %v2819_v54 = vor.u32 %v3054_v46, %v2816_v49  ;;  %v3030_v3 = vld [vmem:[%s3472_s27 + $0x124] sm:$0xf]  ;;  %v3052_v9 = vld [vmem:[%s5023_s1 + $0x54] sm:$0xf]  ;;  %v3852_v27 = vor.u32 %v3031_v63, %v2718_v57  ;;  %v2792_v57 = vld [vmem:[%s5023_s1 + $0x38] sm:$0xf0] }
 0x100   : > { %839 = vmatmul.bf16.gmra.mxu0 %v3803_v0  ;;  %v3856_v44 = vor.u32 %v3030_v3, %v2720_v11  ;;  %v3050_v46 = vld [vmem:[%s5023_s1 + $0x44] sm:$0xf] }
 0x101   : > { %928 = vmatmul.bf16.gmra.mxu1 %v3807_v7  ;;  %1044 = vmatpush.bf16.msra.mxu3 %v2819_v54  ;;  %v3070_v3 = vld [vmem:[%s5023_s1 + $0xe4] sm:$0xf] }
 0x102   : > { %1017 = vmatmul.bf16.gmra.mxu2 %v3809_v8  ;;  %5035 = vst [vmem:[#allocation8_spill] sm:$0xff] %v3856_v44 }
 0x105   : > { %v978_v36 = vpop.f32.mrf.mxu2  ;;  %v802_v39 = vpop.f32.mrf.mxu0 }
 0x106   : > { %v3826_v37 = vadd.f32 %v978_v36, %v890_v10  ;;  %v891_v47 = vpop.f32.mrf.mxu1  ;;  %v2808_v10 = vld [vmem:[%s5023_s1 + $0x58] sm:$0xf0] }
 0x107   : > { %v892_v53 = vadd.f32 %v891_v47, %v802_v39  ;;  %v2811_v20 = vor.u32 %v3052_v9, %v2808_v10  ;;  %v2800_v47 = vld [vmem:[%s5023_s1 + $0x48] sm:$0xf0]  ;;  %v3086_v10 = vld [vmem:[%s5023_s1 + $0x164] sm:$0xf] }
 0x108   : > { %v2803_v49 = vor.u32 %v3050_v46, %v2800_v47  ;;  %v2880_v9 = vld [vmem:[%s5023_s1 + $0xe8] sm:$0xf0] }
 0x109   : > { %1045 = vmatpush.bf16.msra.mxu3 %v2811_v20  ;;  %v2883_v12 = vor.u32 %v3070_v3, %v2880_v9  ;;  %v2784_v46 = vld [vmem:[%s5023_s1 + $0x28] sm:$0xf0]  ;;  %v2730_v3 = vld [vmem:[%s3472_s27 + $0x138] sm:$0xf]  ;;  %v3034_v9 = vld [vmem:[%s3472_s27 + $0x140] sm:$0xf0] }
 0x10b   : > { %1133 = vmatpush.bf16.msrb.mxu0 %v2883_v12  ;;  %v2936_v12 = vld [vmem:[%s5023_s1 + $0x158] sm:$0xf0] }
 0x10d   : > { %v980_v21 = vpop.f32.mrf.mxu2  ;;  %v805_v39 = vpop.f32.mrf.mxu0  ;;  %1046 = vmatpush.bf16.msra.mxu3 %v2803_v49 }
 0x10e   : > { %v3854_v36 = vadd.f32 %v980_v21, %v892_v53  ;;  %v894_v48 = vpop.f32.mrf.mxu1  ;;  %v3048_v53 = vld [vmem:[%s5023_s1 + $0x34] sm:$0xf]  ;;  %v2947_v21 = vor.u32 %v3086_v10, %v2944_v19  ;;  %v3033_v19 = vld [vmem:[%s3472_s27 + $0x13c] sm:$0xf] }
 0x10f   : > { %v3866_v54 = vadd.f32 %v894_v48, %v805_v39  ;;  %v2795_v63 = vor.u32 %v3048_v53, %v2792_v57  ;;  %v3046_v39 = vld [vmem:[%s5023_s1 + $0x24] sm:$0xf]  ;;  %v3068_v53 = vld [vmem:[%s5023_s1 + $0xd4] sm:$0xf]  ;;  %v2872_v57 = vld [vmem:[%s5023_s1 + $0xd8] sm:$0xf0] }
 0x110   : > { %844 = vmatmul.bf16.gmra.mxu0 %v3852_v27  ;;  %v2787_v48 = vor.u32 %v3046_v39, %v2784_v46  ;;  %1222 = vmatpush.bf16.msrb.mxu1 %v2947_v21  ;;  %v2875_v10 = vor.u32 %v3068_v53, %v2872_v57  ;;  %v3044_v21 = vld [vmem:[%s5023_s1 + $0x14] sm:$0xf]  ;;  %v2776_v39 = vld [vmem:[%s5023_s1 + $0x18] sm:$0xf0]  ;;  %v2732_v46 = vld [vmem:[%s3472_s27 + $0x144] sm:$0xf0] }
 0x111   : > { %5037 = vst [vmem:[#allocation10_spill] sm:$0xff] %v3866_v54  ;;  %933 = vmatmul.bf16.gmra.mxu1 %v3856_v44  ;;  %1047 = vmatpush.bf16.msra.mxu3 %v2795_v63  ;;  %v3084_v63 = vld [vmem:[%s5023_s1 + $0x154] sm:$0xf]  ;;  %v2779_v53 = vor.u32 %v3044_v21, %v2776_v39  ;;  %v3066_v57 = vld [vmem:[%s5023_s1 + $0xc4] sm:$0xf]  ;;  %v3934_v54 = vor.u32 %v3034_v9, %v2730_v3 }
 0x112   : > { %1022 = vmatmul.bf16.gmra.mxu2 %v3858_v45  ;;  %1134 = vmatpush.bf16.msrb.mxu0 %v2875_v10  ;;  %v2928_v10 = vld [vmem:[%s5023_s1 + $0x148] sm:$0xf0]  ;;  %v3939_v21 = vor.u32 %v3033_v19, %v2732_v46  ;;  %v3042_v44 = vld [vmem:[%s5023_s1 + $0x4] sm:$0xf]  ;;  %v2856_v19 = vld [vmem:[%s5023_s1 + $0xb8] sm:$0xf0] }
 0x113   : > { %v2768_v3 = vld [vmem:[%s5023_s1 + $0x8] sm:$0xf0]  ;;  %v3080_v46 = vld [vmem:[%s5023_s1 + $0x134] sm:$0xf] }
 0x114   : > { %5041 = vst [vmem:[#allocation14_spill] sm:$0xff] %v3939_v21 }
 0x115   : > { %v3886_v11 = vpop.f32.mrf.mxu2  ;;  %v807_v20 = vpop.f32.mrf.mxu0  ;;  %1048 = vmatpush.bf16.msra.mxu3 %v2787_v48 }
 0x116   : > { %5038 = vst [vmem:[#allocation11_spill] sm:$0xff] %v3886_v11  ;;  %v896_v47 = vpop.f32.mrf.mxu1 }
 0x117   : > { %v3897_v49 = vadd.f32 %v896_v47, %v807_v20  ;;  %v2939_v20 = vor.u32 %v3084_v63, %v2936_v12  ;;  %v2738_v47 = vld [vmem:[%s3472_s27 + $0x140] sm:$0xf]  ;;  %v2864_v63 = vld [vmem:[%s5023_s1 + $0xc8] sm:$0xf0]  ;;  %v3082_v12 = vld [vmem:[%s5023_s1 + $0x144] sm:$0xf] }
 0x118   : > { %v2867_v48 = vor.u32 %v3066_v57, %v2864_v63  ;;  %v2931_v45 = vor.u32 %v3082_v12, %v2928_v10  ;;  %v2771_v57 = vor.u32 %v3042_v44, %v2768_v3  ;;  %v2848_v12 = vld [vmem:[%s5023_s1 + $0xa8] sm:$0xf0] }
 0x119   : > { %5039 = vst [vmem:[#allocation12_spill] sm:$0xff] %v3897_v49  ;;  %v3035_v49 = vld [vmem:[%s3472_s27 + $0x148] sm:$0xf0]  ;;  %1223 = vmatpush.bf16.msrb.mxu1 %v2939_v20  ;;  %1049 = vmatpush.bf16.msra.mxu3 %v2779_v53  ;;  %v3062_v53 = vld [vmem:[%s5023_s1 + $0xa4] sm:$0xf] }
 0x11a   : > { %v3941_v39 = vor.u32 %v3035_v49, %v2738_v47  ;;  %1135 = vmatpush.bf16.msrb.mxu0 %v2867_v48  ;;  %v3064_v49 = vld [vmem:[%s5023_s1 + $0xb4] sm:$0xf]  ;;  %v3078_v48 = vld [vmem:[%s5023_s1 + $0x124] sm:$0xf]  ;;  %v2912_v3 = vld [vmem:[%s5023_s1 + $0x128] sm:$0xf0] }
 0x11b   : > { %v2859_v44 = vor.u32 %v3064_v49, %v2856_v19 }
 0x11c   : > { %5042 = vst [vmem:[#allocation15_spill] sm:$0xff] %v3941_v39 }
 0x11d   : > { %v3932_v11 = vpop.f32.mrf.mxu2  ;;  %v810_v20 = vpop.f32.mrf.mxu0  ;;  %1224 = vmatpush.bf16.msrb.mxu1 %v2931_v45  ;;  %v2920_v45 = vld [vmem:[%s5023_s1 + $0x138] sm:$0xf0]  ;;  %1050 = vmatpush.bf16.msra.mxu3 %v2771_v57  ;;  %v2915_v57 = vor.u32 %v3078_v48, %v2912_v3  ;;  %v3036_v48 = vld [vmem:[%s3472_s27 + $0x154] sm:$0xf]  ;;  %v2744_v3 = vld [vmem:[%s3472_s27 + $0x15c] sm:$0xf0] }
 0x11e   : > { %5040 = vst [vmem:[#allocation13_spill] sm:$0xff] %v3932_v11  ;;  %v899_v9 = vpop.f32.mrf.mxu1  ;;  %v2923_v47 = vor.u32 %v3080_v46, %v2920_v45  ;;  %1136 = vmatpush.bf16.msrb.mxu0 %v2859_v44  ;;  %v3060_v46 = vld [vmem:[%s5023_s1 + $0x94] sm:$0xf]  ;;  %v2840_v44 = vld [vmem:[%s5023_s1 + $0x98] sm:$0xf0] }
 0x11f   : > { %v3949_v63 = vadd.f32 %v899_v9, %v810_v20  ;;  %v2851_v20 = vor.u32 %v3062_v53, %v2848_v12  ;;  %v3076_v45 = vld [vmem:[%s5023_s1 + $0x114] sm:$0xf]  ;;  %v2742_v53 = vld [vmem:[%s3472_s27 + $0x150] sm:$0xf]  ;;  %v3037_v12 = vld [vmem:[%s3472_s27 + $0x158] sm:$0xf0] }
 0x120   : > { %849 = vmatmul.bf16.gmra.mxu0 %v3934_v54  ;;  %1051 = vmatmul.bf16.vlgmr.msra.gmra.mxu3 %v3628_v14  ;;  %v2843_v14 = vor.u32 %v3060_v46, %v2840_v44  ;;  %v3074_v46 = vld [vmem:[%s5023_s1 + $0x104] sm:$0xf] }
 0x121   : > { %5043 = vst [vmem:[#allocation16_spill] sm:$0xff] %v3949_v63  ;;  %938 = vmatmul.bf16.gmra.mxu1 %v3939_v21  ;;  %v4017_v63 = vor.u32 %v3036_v48, %v2744_v3  ;;  %v2754_v3 = vld [vmem:[%s3472_s27 + $0x168] sm:$0xf] }
 0x122   : > { %1027 = vmatmul.bf16.gmra.mxu2 %v3941_v39  ;;  %1225 = vmatpush.bf16.msrb.mxu1 %v2923_v47  ;;  %v2904_v47 = vld [vmem:[%s5023_s1 + $0x118] sm:$0xf0] }
 0x123   : > { %1137 = vmatpush.bf16.msrb.mxu0 %v2851_v20  ;;  %v2907_v20 = vor.u32 %v3076_v45, %v2904_v47 }
 0x125   : > { %v3975_v10 = vpop.f32.mrf.mxu2  ;;  %v812_v9 = vpop.f32.mrf.mxu0 }
 0x126   : > { %5044 = vst [vmem:[#allocation17_spill] sm:$0xff] %v3975_v10  ;;  %v901_v49 = vpop.f32.mrf.mxu1  ;;  %1226 = vmatpush.bf16.msrb.mxu1 %v2915_v57  ;;  %v2832_v57 = vld [vmem:[%s5023_s1 + $0x88] sm:$0xf0]  ;;  %v4012_v10 = vor.u32 %v3037_v12, %v2742_v53 }
 0x127   : > { %v3981_v19 = vadd.f32 %v901_v49, %v812_v9  ;;  %v2750_v9 = vld [vmem:[%s3472_s27 + $0x158] sm:$0xf]  ;;  %v3038_v49 = vld [vmem:[%s3472_s27 + $0x160] sm:$0xf0]  ;;  %1138 = vmatpush.bf16.msrb.mxu0 %v2843_v14  ;;  %v2896_v14 = vld [vmem:[%s5023_s1 + $0x108] sm:$0xf0] }
 0x128   : > { %v4019_v39 = vor.u32 %v3038_v49, %v2750_v9  ;;  %v2899_v21 = vor.u32 %v3074_v46, %v2896_v14  ;;  %v3039_v9 = vld [vmem:[%s3472_s27 + $0x16c] sm:$0xf]  ;;  %v2756_v49 = vld [vmem:[%s3472_s27 + $0x174] sm:$0xf0]  ;;  %v3041_v46 = vld [vmem:[%s3472_s27 + $0x178] sm:$0xf0] }
 0x129   : > { %5045 = vst [vmem:[#allocation18_spill] sm:$0xff] %v3981_v19  ;;  %v3058_v19 = vld [vmem:[%s5023_s1 + $0x84] sm:$0xf] }
 0x12a   : > { %1227 = vmatpush.bf16.msrb.mxu1 %v2907_v20  ;;  %v2835_v45 = vor.u32 %v3058_v19, %v2832_v57  ;;  %v2762_v57 = vld [vmem:[%s3472_s27 + $0x170] sm:$0xf] }
 0x12c   : > { %1139 = vmatpush.bf16.msrb.mxu0 %v2835_v45 }
 0x12d   : > { %v4010_v44 = vpop.f32.mrf.mxu2  ;;  %v815_v47 = vpop.f32.mrf.mxu0 }
 0x12e   : > { %v904_v11 = vpop.f32.mrf.mxu1  ;;  %1228 = vmatpush.bf16.msrb.mxu1 %v2899_v21 }
 0x12f   : > { %v4021_v53 = vadd.f32 %v904_v11, %v815_v47  ;;  %v3040_v11 = vld [vmem:[%s3472_s27 + $0x170] sm:$0xf0]  ;;  %v4041_v47 = vor.u32 %v3039_v9, %v2756_v49  ;;  %s3374_s27 = smov 64  }
 0x130   : > { %854 = vmatmul.bf16.gmra.mxu0 %v4012_v10  ;;  %1056 = vmatmul.bf16.gmra.mxu3 %v3643_v23  ;;  %v4039_v21 = vor.u32 %v3040_v11, %v2754_v3 }
 0x131   : > { %5046 = vst [vmem:[#allocation19_spill] sm:$0xff] %v4021_v53  ;;  %943 = vmatmul.bf16.gmra.mxu1 %v4017_v63 }
 0x132   : > { %1032 = vmatmul.bf16.gmra.mxu2 %v4019_v39 }
 0x135   : > { %v4026_v19 = vpop.f32.mrf.mxu2  ;;  %v817_v12 = vpop.f32.mrf.mxu0 }
 0x136   : > { %5047 = vst [vmem:[#allocation20_spill] sm:$0xff] %v4026_v19  ;;  %v906_v48 = vpop.f32.mrf.mxu1  ;;  %v4043_v19 = vor.u32 %v3041_v46, %v2762_v57 }
 0x137   : > { %v4029_v20 = vadd.f32 %v906_v48, %v817_v12 }
 0x13d   : > { %v4037_v45 = vpop.f32.mrf.mxu2  ;;  %v820_v14 = vpop.f32.mrf.mxu0 }
 0x13e   : > { %v909_v53 = vpop.f32.mrf.mxu1 }
 0x13f   : > { %v4045_v23 = vadd.f32 %v909_v53, %v820_v14 }
 0x140   : > { %859 = vmatmul.bf16.gmra.mxu0 %v4039_v21  ;;  %1061 = vmatmul.bf16.gmra.mxu3 %v3658_v32 }
 0x141   : > { %5048 = vst [vmem:[#allocation21_spill] sm:$0xff] %v4045_v23  ;;  %948 = vmatmul.bf16.gmra.mxu1 %v4041_v47 }
 0x142   : > { %1037 = vmatmul.bf16.gmra.mxu2 %v4043_v19 }
 0x145   : > { %v4050_v12 = vpop.f32.mrf.mxu2  ;;  %v822_v48 = vpop.f32.mrf.mxu0 }
 0x146   : > { %5049 = vst [vmem:[#allocation22_spill] sm:$0xff] %v4050_v12  ;;  %v911_v3 = vpop.f32.mrf.mxu1 }
 0x147   : > { %v4053_v11 = vadd.f32 %v911_v3, %v822_v48 }
 0x149   : > { %5050 = vst [vmem:[#allocation23_spill] sm:$0xff] %v4053_v11 }
 0x14d   : > { %v4055_v9 = vpop.f32.mrf.mxu2  ;;  %v825_v49 = vpop.f32.mrf.mxu0 }
 0x14e   : > { %5051 = vst [vmem:[#allocation24_spill] sm:$0xff] %v4055_v9  ;;  %v914_v57 = vpop.f32.mrf.mxu1 }
 0x14f   : > { %v915_v53 = vadd.f32 %v914_v57, %v825_v49 }
 0x150   : > { %1140 = vmatmul.bf16.vlgmr.msrb.gmra.mxu0 %v3630_v15  ;;  %1066 = vmatmul.bf16.gmra.mxu3 %v3673_v41 }
 0x151   : > { %1229 = vmatmul.bf16.vlgmr.msrb.gmra.mxu1 %v3632_v16 }
 0x155   : > { %v1003_v46 = vpop.f32.mrf.mxu2  ;;  %v827_v23 = vpop.f32.mrf.mxu0 }
 0x156   : > { %v4059_v14 = vadd.f32 %v1003_v46, %v915_v53  ;;  %v916_v12 = vpop.f32.mrf.mxu1 }
 0x157   : > { %v4062_v32 = vadd.f32 %v916_v12, %v827_v23 }
 0x15d   : > { %v4064_v48 = vpop.f32.mrf.mxu2  ;;  %v830_v3 = vpop.f32.mrf.mxu0 }
 0x15e   : > { %v919_v9 = vpop.f32.mrf.mxu1 }
 0x15f   : > { %v920_v11 = vadd.f32 %v919_v9, %v830_v3 }
 0x160   : > { %1145 = vmatmul.bf16.gmra.mxu0 %v3645_v24  ;;  %1071 = vmatmul.bf16.gmra.mxu3 %v3688_v50 }
 0x161   : > { %1234 = vmatmul.bf16.gmra.mxu1 %v3647_v25 }
 0x165   : > { %v1008_v15 = vpop.f32.mrf.mxu2  ;;  %v832_v49 = vpop.f32.mrf.mxu0 }
 0x166   : > { %v4068_v16 = vadd.f32 %v1008_v15, %v920_v11  ;;  %v921_v57 = vpop.f32.mrf.mxu1 }
 0x167   : > { %v4071_v41 = vadd.f32 %v921_v57, %v832_v49 }
 0x16d   : > { %v4073_v23 = vpop.f32.mrf.mxu2  ;;  %v835_v12 = vpop.f32.mrf.mxu0 }
 0x16e   : > { %v924_v53 = vpop.f32.mrf.mxu1 }
 0x16f   : > { %v4075_v46 = vadd.f32 %v924_v53, %v835_v12 }
 0x170   : > { %1150 = vmatmul.bf16.gmra.mxu0 %v3660_v33  ;;  %1076 = vmatmul.bf16.gmra.mxu3 %v3703_v59 }
 0x171   : > { %1239 = vmatmul.bf16.gmra.mxu1 %v3662_v34 }
 0x175   : > { %v4079_v24 = vpop.f32.mrf.mxu2  ;;  %v837_v25 = vpop.f32.mrf.mxu0 }
 0x176   : > { %v926_v11 = vpop.f32.mrf.mxu1 }
 0x177   : > { %v4082_v50 = vadd.f32 %v926_v11, %v837_v25 }
 0x17d   : > { %v4084_v9 = vpop.f32.mrf.mxu2  ;;  %v840_v3 = vpop.f32.mrf.mxu0 }
 0x17e   : > { %v929_v15 = vpop.f32.mrf.mxu1 }
 0x17f   : > { %v4086_v49 = vadd.f32 %v929_v15, %v840_v3 }
 0x180   : > { %1155 = vmatmul.bf16.gmra.mxu0 %v3675_v42  ;;  %1081 = vmatmul.bf16.gmra.mxu3 %v3718_v4 }
 0x181   : > { %1244 = vmatmul.bf16.gmra.mxu1 %v3677_v43 }
 0x185   : > { %v4090_v33 = vpop.f32.mrf.mxu2  ;;  %v842_v34 = vpop.f32.mrf.mxu0 }
 0x186   : > { %v931_v57 = vpop.f32.mrf.mxu1 }
 0x187   : > { %v4093_v59 = vadd.f32 %v931_v57, %v842_v34 }
 0x189   : > { %5052 = vst [vmem:[#allocation25_spill] sm:$0xff] %v4093_v59 }
 0x18d   : > { %v4095_v12 = vpop.f32.mrf.mxu2  ;;  %v845_v53 = vpop.f32.mrf.mxu0 }
 0x18e   : > { %v934_v25 = vpop.f32.mrf.mxu1 }
 0x18f   : > { %v935_v11 = vadd.f32 %v934_v25, %v845_v53 }
 0x190   : > { %1160 = vmatmul.bf16.gmra.mxu0 %v3690_v51  ;;  %1086 = vmatmul.bf16.gmra.mxu3 %v3733_v13 }
 0x191   : > { %1249 = vmatmul.bf16.gmra.mxu1 %v3692_v52 }
 0x195   : > { %v1023_v42 = vpop.f32.mrf.mxu2  ;;  %v847_v43 = vpop.f32.mrf.mxu0 }
 0x196   : > { %v4099_v3 = vadd.f32 %v1023_v42, %v935_v11  ;;  %v936_v15 = vpop.f32.mrf.mxu1 }
 0x197   : > { %v4102_v4 = vadd.f32 %v936_v15, %v847_v43 }
 0x19d   : > { %v850_v34 = vpop.f32.mrf.mxu0 }
 0x19e   : > { %v939_v57 = vpop.f32.mrf.mxu1 }
 0x19f   : > { %v4104_v59 = vadd.f32 %v939_v57, %v850_v34 }
 0x1a0   : > { %1165 = vmatmul.bf16.gmra.mxu0 %v3705_v60  ;;  %1091 = vmatmul.bf16.gmra.mxu3 %v3748_v28 }
 0x1a1   : > { %1254 = vmatmul.bf16.gmra.mxu1 %v3707_v61 }
 0x1a3   : > { %v1052_v25 = vpop.f32.mrf.mxu3 }
 0x1a5   : > { %v852_v51 = vpop.f32.mrf.mxu0 }
 0x1a6   : > { %v941_v52 = vpop.f32.mrf.mxu1 }
 0x1a7   : > { %v4109_v53 = vadd.f32 %v941_v52, %v852_v51 }
 0x1a9   : > { %5053 = vst [vmem:[#allocation26_spill] sm:$0xff] %v4109_v53 }
 0x1ab   : > { %v1054_v43 = vpop.f32.mrf.mxu3 }
 0x1ad   : > { %v855_v11 = vpop.f32.mrf.mxu0 }
 0x1ae   : > { %v944_v13 = vpop.f32.mrf.mxu1 }
 0x1af   : > { %v4111_v42 = vadd.f32 %v944_v13, %v855_v11 }
 0x1b0   : > { %1170 = vmatmul.bf16.gmra.mxu0 %v3720_v5  ;;  %1096 = vmatmul.bf16.gmra.mxu3 %v3765_v55 }
 0x1b1   : > { %5054 = vst [vmem:[#allocation27_spill] sm:$0xff] %v4111_v42  ;;  %1259 = vmatmul.bf16.gmra.mxu1 %v3722_v6 }
 0x1b3   : > { %v1057_v28 = vpop.f32.mrf.mxu3 }
 0x1b5   : > { %v857_v15 = vpop.f32.mrf.mxu0 }
 0x1b6   : > { %v946_v60 = vpop.f32.mrf.mxu1 }
 0x1b7   : > { %v4116_v61 = vadd.f32 %v946_v60, %v857_v15 }
 0x1b9   : > { %5055 = vst [vmem:[#allocation28_spill] sm:$0xff] %v4116_v61 }
 0x1bb   : > { %v1059_v52 = vpop.f32.mrf.mxu3 }
 0x1bd   : > { %v860_v34 = vpop.f32.mrf.mxu0 }
 0x1be   : > { %v949_v57 = vpop.f32.mrf.mxu1 }
 0x1bf   : > { %v4118_v51 = vadd.f32 %v949_v57, %v860_v34 }
 0x1c0   : > { %1175 = vmatmul.bf16.gmra.mxu0 %v3735_v17  ;;  %1101 = vmatmul.bf16.gmra.mxu3 %v3784_v22 }
 0x1c1   : > { %5056 = vst [vmem:[#allocation29_spill] sm:$0xff] %v4118_v51  ;;  %1264 = vmatmul.bf16.gmra.mxu1 %v3737_v18 }
 0x1c3   : > { %v1062_v55 = vpop.f32.mrf.mxu3 }
 0x1c5   : > { %v862_v5 = vpop.f32.mrf.mxu0 }
 0x1c6   : > { %v951_v6 = vpop.f32.mrf.mxu1 }
 0x1c7   : > { %v4123_v11 = vadd.f32 %v951_v6, %v862_v5 }
 0x1c9   : > { %5057 = vst [vmem:[#allocation30_spill] sm:$0xff] %v4123_v11 }
 0x1cb   : > { %v1064_v34 = vpop.f32.mrf.mxu3 }
 0x1cd   : > { %v1141_v13 = vpop.f32.mrf.mxu0 }
 0x1ce   : > { %v1142_v15 = vadd.f32 %v1141_v13, %v1052_v25  ;;  %v1230_v60 = vpop.f32.mrf.mxu1 }
 0x1d0   : > { %v1231_v61 = vadd.f32 %v1230_v60, %v1142_v15  ;;  %1180 = vmatmul.bf16.gmra.mxu0 %v3750_v30  ;;  %1106 = vmatmul.bf16.gmra.mxu3 %v3803_v0 }
 0x1d1   : > { %1269 = vmatmul.bf16.gmra.mxu1 %v3752_v31 }
 0x1d2   : > { %v1310_v17 = vpack.c.bf16 %v1231_v61, %v3757_v38 }
 0x1d3   : > { %v1067_v5 = vpop.f32.mrf.mxu3 }
 0x1d4   : > { %v2102_v6 = vrot.slane %v1310_v17, 4  ;;  %v1350_v25 = vunpack.c.l.b16 %v1310_v17 }
 0x1d5   : > { %v1143_v57 = vpop.f32.mrf.mxu0 }
 0x1d6   : > { %v1144_v18 = vadd.f32 %v1143_v57, %v1054_v43  ;;  %v1232_v22 = vpop.f32.mrf.mxu1  ;;  %v4130_v30 = vunpack.c.l.b16 %v2102_v6 }
 0x1d8   : > { %v1233_v51 = vadd.f32 %v1232_v22, %v1144_v18 }
 0x1da   : > { %v1311_v11 = vpack.c.bf16 %v1233_v51, %v3767_v56 }
 0x1db   : > { %v1069_v0 = vpop.f32.mrf.mxu3 }
 0x1dc   : > { %v1351_v13 = vunpack.c.l.b16 %v1311_v11  ;;  %v2103_v15 = vrot.slane %v1311_v11, 4 }
 0x1dd   : > { %v1146_v60 = vpop.f32.mrf.mxu0 }
 0x1de   : > { %v1147_v42 = vadd.f32 %v1146_v60, %v1057_v28  ;;  %v1235_v31 = vpop.f32.mrf.mxu1  ;;  %v4132_v53 = vpack.c.b16 %v1351_v13, %v1350_v25  ;;  %v4134_v38 = vunpack.c.l.b16 %v2103_v15 }
 0x1e0   : > { %1185 = vmatmul.bf16.gmra.mxu0 %v3769_v58  ;;  %v1236_v56 = vadd.f32 %v1235_v31, %v1147_v42  ;;  %1111 = vmatmul.bf16.gmra.mxu3 %v3852_v27 }
 0x1e1   : > { %1274 = vmatmul.bf16.gmra.mxu1 %v3771_v62 }
 0x1e2   : > { %v1312_v51 = vpack.c.bf16 %v1236_v56, %v3776_v2 }
 0x1e3   : > { %v1072_v57 = vpop.f32.mrf.mxu3 }
 0x1e4   : > { %v2104_v18 = vrot.slane %v1312_v51, 4  ;;  %v1352_v6 = vunpack.c.l.b16 %v1312_v51 }
 0x1e5   : > { %v1148_v61 = vpop.f32.mrf.mxu0 }
 0x1e6   : > { %v1149_v28 = vadd.f32 %v1148_v61, %v1059_v52  ;;  %v1237_v11 = vpop.f32.mrf.mxu1  ;;  %v4143_v15 = vunpack.c.l.b16 %v2104_v18 }
 0x1e8   : > { %v1238_v17 = vadd.f32 %v1237_v11, %v1149_v28 }
 0x1ea   : > { %v1313_v22 = vpack.c.bf16 %v1238_v17, %v3786_v26 }
 0x1eb   : > { %v1074_v2 = vpop.f32.mrf.mxu3 }
 0x1ec   : > { %v2105_v58 = vrot.slane %v1313_v22, 4  ;;  %v1353_v25 = vunpack.c.l.b16 %v1313_v22 }
 0x1ed   : > { %v1151_v13 = vpop.f32.mrf.mxu0 }
 0x1ee   : > { %v1152_v62 = vadd.f32 %v1151_v13, %v1062_v55  ;;  %v1240_v42 = vpop.f32.mrf.mxu1  ;;  %v4145_v60 = vpack.c.b16 %v1353_v25, %v1352_v6  ;;  %v4147_v27 = vunpack.c.l.b16 %v2105_v58 }
 0x1f0   : > { %1190 = vmatmul.bf16.gmra.mxu0 %v3788_v29  ;;  %1364 = vrot.lane.b32.xlu2 %v4145_v60, %s3374_s27  ;;  %v1241_v52 = vadd.f32 %v1240_v42, %v1152_v62 }
 0x1f1   : > { %1279 = vmatmul.bf16.gmra.mxu1 %v3790_v35  ;;  %1116 = vmatmul.bf16.gmra.mxu3 %v3934_v54 }
 0x1f2   : > { %v1314_v55 = vpack.c.bf16 %v1241_v52, %v3795_v40 }
 0x1f3   : > { %v1077_v29 = vpop.f32.mrf.mxu3 }
 0x1f4   : > { %v2106_v28 = vrot.slane %v1314_v55, 4  ;;  %v1354_v18 = vunpack.c.l.b16 %v1314_v55 }
 0x1f5   : > { %v1153_v31 = vpop.f32.mrf.mxu0 }
 0x1f6   : > { %v1154_v56 = vadd.f32 %v1153_v31, %v1064_v34  ;;  %v1242_v61 = vpop.f32.mrf.mxu1  ;;  %v4158_v6 = vunpack.c.l.b16 %v2106_v28 }
 0x1f8   : > { %v1243_v51 = vadd.f32 %v1242_v61, %v1154_v56 }
 0x1fa   : > { %v1315_v11 = vpack.c.bf16 %v1243_v51, %v3805_v1 }
 0x1fb   : > { %v1079_v40 = vpop.f32.mrf.mxu3 }
 0x1fc   : > { %v2107_v17 = vrot.slane %v1315_v11, 4  ;;  %v1355_v22 = vunpack.c.l.b16 %v1315_v11 }
 0x1fd   : > { %v1156_v58 = vpop.f32.mrf.mxu0 }
 0x1fe   : > { %v1157_v35 = vadd.f32 %v1156_v58, %v1067_v5  ;;  %v1245_v25 = vpop.f32.mrf.mxu1  ;;  %v4160_v13 = vpack.c.b16 %v1355_v22, %v1354_v18  ;;  %v4162_v54 = vunpack.c.l.b16 %v2107_v17 }
 0x200   : > { %1195 = vmatmul.bf16.gmra.mxu0 %v3807_v7  ;;  %1366 = vrot.lane.b32.xlu1 %v4160_v13, %s3374_s27  ;;  %v1246_v34 = vadd.f32 %v1245_v25, %v1157_v35  ;;  %v5060_v25 = vld [vmem:[#allocation10_spill] sm:$0xff] }
 0x201   : > { %1284 = vmatmul.bf16.gmra.mxu1 %v3809_v8  ;;  %1121 = vmatmul.bf16.gmra.mxu3 %v4012_v10 }
 0x202   : > { %v1316_v5 = vpack.c.bf16 %v1246_v34, %v3826_v37  ;;  %v5058_v37 = vld [vmem:[#allocation8_spill] sm:$0xff]  ;;  %v5061_v34 = vld [vmem:[#allocation11_spill] sm:$0xff] }
 0x203   : > { %v1082_v55 = vpop.f32.mrf.mxu3 }
 0x204   : > { %v2108_v7 = vrot.slane %v1316_v5, 4  ;;  %v1356_v51 = vunpack.c.l.b16 %v1316_v5 }
 0x205   : > { %v1158_v62 = vpop.f32.mrf.mxu0 }
 0x206   : > { %v1159_v42 = vadd.f32 %v1158_v62, %v1069_v0  ;;  %v1247_v52 = vpop.f32.mrf.mxu1  ;;  %v4173_v17 = vunpack.c.l.b16 %v2108_v7  ;;  %v5059_v0 = vld [vmem:[#allocation9_spill] sm:$0xff]  ;;  %v984_v62 = vadd.f32 %v5061_v34, %v5060_v25 }
 0x207   : > { %v5063_v7 = vld [vmem:[#allocation13_spill] sm:$0xff] }
 0x208   : > { %v1248_v31 = vadd.f32 %v1247_v52, %v1159_v42 }
 0x20a   : > { %v1317_v56 = vpack.c.bf16 %v1248_v31, %v3854_v36  ;;  %v5062_v31 = vld [vmem:[#allocation12_spill] sm:$0xff] }
 0x20b   : > { %v1084_v35 = vpop.f32.mrf.mxu3 }
 0x20c   : > { %v2109_v61 = vrot.slane %v1317_v56, 4  ;;  %v1357_v28 = vunpack.c.l.b16 %v1317_v56  ;;  %v986_v56 = vadd.f32 %v5063_v7, %v5062_v31 }
 0x20d   : > { %v1161_v11 = vpop.f32.mrf.mxu0 }
 0x20e   : > { %v4175_v8 = vunpack.c.l.b16 %v2109_v61  ;;  %v1162_v18 = vadd.f32 %v1161_v11, %v1072_v57  ;;  %v1250_v22 = vpop.f32.mrf.mxu1  ;;  %v4177_v10 = vpack.c.b16 %v1357_v28, %v1356_v51 }
 0x210   : > { %1200 = vmatmul.bf16.gmra.mxu0 %v5058_v37  ;;  %1368 = vrot.lane.b32.xlu0 %v4177_v10, %s3374_s27  ;;  %v1251_v58 = vadd.f32 %v1250_v22, %v1162_v18 }
 0x211   : > { %1289 = vmatmul.bf16.gmra.mxu1 %v5059_v0  ;;  %1126 = vmatmul.bf16.gmra.mxu3 %v4039_v21 }
 0x212   : > { %v1318_v57 = vpack.c.bf16 %v1251_v58, %v984_v62 }
 0x213   : > { %v1087_v18 = vpop.f32.mrf.mxu3 }
 0x214   : > { %v2187_v51 = vrot.slane %v1318_v57, 4  ;;  %v1432_v11 = vunpack.c.l.b16 %v1318_v57 }
 0x215   : > { %v1163_v5 = vpop.f32.mrf.mxu0 }
 0x216   : > { %v1164_v42 = vadd.f32 %v1163_v5, %v1074_v2  ;;  %v1252_v52 = vpop.f32.mrf.mxu1  ;;  %v4190_v43 = vunpack.c.l.b16 %v2187_v51  ;;  %v5064_v2 = vld [vmem:[#allocation14_spill] sm:$0xff]  ;;  %v5065_v5 = vld [vmem:[#allocation15_spill] sm:$0xff] }
 0x218   : > { %v1253_v61 = vadd.f32 %v1252_v52, %v1164_v42  ;;  %v5066_v42 = vld [vmem:[#allocation16_spill] sm:$0xff]  ;;  %v5067_v52 = vld [vmem:[#allocation17_spill] sm:$0xff] }
 0x219   : > { %v989_v31 = vadd.f32 %v5067_v52, %v5066_v42 }
 0x21a   : > { %v1319_v28 = vpack.c.bf16 %v1253_v61, %v986_v56 }
 0x21c   : > { %v1433_v37 = vunpack.c.l.b16 %v1319_v28  ;;  %v2188_v0 = vrot.slane %v1319_v28, 4  ;;  %v1089_v28 = vpop.f32.mrf.mxu3 }
 0x21d   : > { %v1166_v22 = vpop.f32.mrf.mxu0 }
 0x21e   : > { %v4192_v25 = vunpack.c.l.b16 %v2188_v0  ;;  %v1167_v34 = vadd.f32 %v1166_v22, %v1077_v29  ;;  %v1255_v21 = vpop.f32.mrf.mxu1  ;;  %v4194_v58 = vpack.c.b16 %v1433_v37, %v1432_v11  ;;  %v5068_v29 = vld [vmem:[#allocation18_spill] sm:$0xff] }
 0x21f   : > { %v991_v11 = vadd.f32 %v4010_v44, %v5068_v29 }
 0x220   : > { %1205 = vmatmul.bf16.gmra.mxu0 %v5064_v2  ;;  %v1256_v57 = vadd.f32 %v1255_v21, %v1167_v34 }
 0x221   : > { %1294 = vmatmul.bf16.gmra.mxu1 %v5065_v5 }
 0x222   : > { %v1320_v56 = vpack.c.bf16 %v1256_v57, %v989_v31  ;;  %v5069_v31 = vld [vmem:[#allocation19_spill] sm:$0xff] }
 0x224   : > { %v2189_v0 = vrot.slane %v1320_v56, 4  ;;  %v1434_v2 = vunpack.c.l.b16 %v1320_v56 }
 0x225   : > { %v1168_v7 = vpop.f32.mrf.mxu0 }
 0x226   : > { %v1169_v61 = vadd.f32 %v1168_v7, %v1079_v40  ;;  %v1257_v51 = vpop.f32.mrf.mxu1  ;;  %v4204_v5 = vunpack.c.l.b16 %v2189_v0  ;;  %v1092_v40 = vpop.f32.mrf.mxu3  ;;  %v5070_v7 = vld [vmem:[#allocation20_spill] sm:$0xff] }
 0x228   : > { %v1258_v37 = vadd.f32 %v1257_v51, %v1169_v61 }
 0x22a   : > { %v1321_v22 = vpack.c.bf16 %v1258_v37, %v991_v11 }
 0x22c   : > { %v1435_v26 = vunpack.c.l.b16 %v1321_v22  ;;  %v2190_v62 = vrot.slane %v1321_v22, 4 }
 0x22d   : > { %v1171_v1 = vpop.f32.mrf.mxu0 }
 0x22e   : > { %v4206_v34 = vunpack.c.l.b16 %v2190_v62  ;;  %v1172_v21 = vadd.f32 %v1171_v1, %v1082_v55  ;;  %v1260_v42 = vpop.f32.mrf.mxu1  ;;  %v4208_v57 = vpack.c.b16 %v1435_v26, %v1434_v2  ;;  %v994_v62 = vadd.f32 %v5070_v7, %v5069_v31  ;;  %v1094_v61 = vpop.f32.mrf.mxu3  ;;  %v5071_v7 = vld [vmem:[#allocation21_spill] sm:$0xff] }
 0x230   : > { %1210 = vmatmul.bf16.gmra.mxu0 %v4017_v63  ;;  %1446 = vrot.lane.b32.xlu2 %v4208_v57, %s3374_s27  ;;  %v1261_v52 = vadd.f32 %v1260_v42, %v1172_v21  ;;  %v996_v63 = vadd.f32 %v4037_v45, %v4029_v20 }
 0x231   : > { %1299 = vmatmul.bf16.gmra.mxu1 %v4019_v39 }
 0x232   : > { %v1322_v1 = vpack.c.bf16 %v1261_v52, %v994_v62  ;;  %v5072_v62 = vld [vmem:[#allocation22_spill] sm:$0xff] }
 0x234   : > { %v2191_v29 = vrot.slane %v1322_v1, 4  ;;  %v1436_v37 = vunpack.c.l.b16 %v1322_v1 }
 0x235   : > { %v1173_v56 = vpop.f32.mrf.mxu0 }
 0x236   : > { %v1174_v55 = vadd.f32 %v1173_v56, %v1084_v35  ;;  %v1262_v26 = vpop.f32.mrf.mxu1  ;;  %v4220_v39 = vunpack.c.l.b16 %v2191_v29  ;;  %v1097_v45 = vpop.f32.mrf.mxu3  ;;  %v999_v56 = vadd.f32 %v5072_v62, %v5071_v7 }
 0x238   : > { %v1263_v51 = vadd.f32 %v1262_v26, %v1174_v55 }
 0x23a   : > { %v1323_v11 = vpack.c.bf16 %v1263_v51, %v996_v63  ;;  %v5073_v63 = vld [vmem:[#allocation23_spill] sm:$0xff]  ;;  %v5074_v51 = vld [vmem:[#allocation24_spill] sm:$0xff] }
 0x23c   : > { %v1437_v0 = vunpack.c.l.b16 %v1323_v11  ;;  %v2192_v22 = vrot.slane %v1323_v11, 4 }
 0x23d   : > { %v1176_v2 = vpop.f32.mrf.mxu0 }
 0x23e   : > { %v4222_v21 = vunpack.c.l.b16 %v2192_v22  ;;  %v1177_v42 = vadd.f32 %v1176_v2, %v1087_v18  ;;  %v1265_v31 = vpop.f32.mrf.mxu1  ;;  %v4224_v52 = vpack.c.b16 %v1437_v0, %v1436_v37  ;;  %v1099_v0 = vpop.f32.mrf.mxu3 }
 0x240   : > { %1215 = vmatmul.bf16.gmra.mxu0 %v4041_v47  ;;  %1448 = vrot.lane.b32.xlu1 %v4224_v52, %s3374_s27  ;;  %v1266_v35 = vadd.f32 %v1265_v31, %v1177_v42  ;;  %v1001_v47 = vadd.f32 %v5074_v51, %v5073_v63 }
 0x241   : > { %1304 = vmatmul.bf16.gmra.mxu1 %v4043_v19 }
 0x242   : > { %v1324_v18 = vpack.c.bf16 %v1266_v35, %v999_v56 }
 0x244   : > { %v2193_v11 = vrot.slane %v1324_v18, 4  ;;  %v1438_v19 = vunpack.c.l.b16 %v1324_v18 }
 0x245   : > { %v1178_v1 = vpop.f32.mrf.mxu0 }
 0x246   : > { %v1179_v55 = vadd.f32 %v1178_v1, %v1089_v28  ;;  %v1267_v26 = vpop.f32.mrf.mxu1  ;;  %v4238_v31 = vunpack.c.l.b16 %v2193_v11 }
 0x248   : > { %v1268_v29 = vadd.f32 %v1267_v26, %v1179_v55  ;;  %1444 = vrot.lane.b32.xlu1 %v4194_v58, %s3374_s27  ;;  %v1102_v26 = vpop.f32.mrf.mxu3 }
 0x24a   : > { %v1325_v37 = vpack.c.bf16 %v1268_v29, %v1001_v47  ;;  %v1006_v47 = vadd.f32 %v4064_v48, %v4062_v32 }
 0x24c   : > { %v1439_v22 = vunpack.c.l.b16 %v1325_v37  ;;  %v2194_v2 = vrot.slane %v1325_v37, 4 }
 0x24d   : > { %v1181_v42 = vpop.f32.mrf.mxu0 }
 0x24e   : > { %v4240_v7 = vunpack.c.l.b16 %v2194_v2  ;;  %v1182_v28 = vadd.f32 %v1181_v42, %v1092_v40  ;;  %v1270_v35 = vpop.f32.mrf.mxu1  ;;  %v4242_v62 = vpack.c.b16 %v1439_v22, %v1438_v19 }
 0x250   : > { %v1271_v1 = vadd.f32 %v1270_v35, %v1182_v28  ;;  %1450 = vrot.lane.b32.xlu0 %v4242_v62, %s3374_s27 }
 0x252   : > { %v1326_v18 = vpack.c.bf16 %v1271_v1, %v4059_v14  ;;  %v1104_v1 = vpop.f32.mrf.mxu3 }
 0x254   : > { %v2272_v29 = vrot.slane %v1326_v18, 4  ;;  %v1513_v37 = vunpack.c.l.b16 %v1326_v18 }
 0x255   : > { %v1183_v55 = vpop.f32.mrf.mxu0 }
 0x256   : > { %v1184_v63 = vadd.f32 %v1183_v55, %v1094_v61  ;;  %v1272_v51 = vpop.f32.mrf.mxu1  ;;  %v4253_v42 = vunpack.c.l.b16 %v2272_v29 }
 0x258   : > { %v1273_v40 = vadd.f32 %v1272_v51, %v1184_v63  ;;  %1362 = vrot.lane.b32.xlu0 %v4132_v53, %s3374_s27 }
 0x25a   : > { %v1327_v11 = vpack.c.bf16 %v1273_v40, %v1006_v47  ;;  %v1011_v47 = vadd.f32 %v4073_v23, %v4071_v41  ;;  %v1107_v29 = vpop.f32.mrf.mxu3 }
 0x25c   : > { %v1514_v19 = vunpack.c.l.b16 %v1327_v11  ;;  %v2273_v22 = vrot.slane %v1327_v11, 4 }
 0x25d   : > { %v1186_v2 = vpop.f32.mrf.mxu0 }
 0x25e   : > { %v4255_v14 = vunpack.c.l.b16 %v2273_v22  ;;  %v1187_v28 = vadd.f32 %v1186_v2, %v1097_v45  ;;  %v1275_v61 = vpop.f32.mrf.mxu1  ;;  %v4257_v35 = vpack.c.b16 %v1514_v19, %v1513_v37 }
 0x260   : > { %v1276_v32 = vadd.f32 %v1275_v61, %v1187_v28 }
 0x262   : > { %v1328_v55 = vpack.c.bf16 %v1276_v32, %v4068_v16  ;;  %v1109_v23 = vpop.f32.mrf.mxu3 }
 0x264   : > { %v2274_v11 = vrot.slane %v1328_v55, 4  ;;  %v1515_v22 = vunpack.c.l.b16 %v1328_v55 }
 0x265   : > { %v1188_v63 = vpop.f32.mrf.mxu0 }
 0x266   : > { %v1189_v18 = vadd.f32 %v1188_v63, %v1099_v0  ;;  %v1277_v51 = vpop.f32.mrf.mxu1  ;;  %v4264_v28 = vunpack.c.l.b16 %v2274_v11  ;;  %v1014_v63 = vadd.f32 %v4079_v24, %v4075_v46 }
 0x268   : > { %v1278_v40 = vadd.f32 %v1277_v51, %v1189_v18 }
 0x26a   : > { %v1329_v45 = vpack.c.bf16 %v1278_v40, %v1011_v47  ;;  %v1016_v40 = vadd.f32 %v4084_v9, %v4082_v50  ;;  %v1112_v0 = vpop.f32.mrf.mxu3 }
 0x26c   : > { %v1516_v37 = vunpack.c.l.b16 %v1329_v45  ;;  %v2275_v19 = vrot.slane %v1329_v45, 4 }
 0x26d   : > { %v1191_v2 = vpop.f32.mrf.mxu0 }
 0x26e   : > { %v4266_v61 = vunpack.c.l.b16 %v2275_v19  ;;  %v1192_v48 = vadd.f32 %v1191_v2, %v1102_v26  ;;  %v1280_v16 = vpop.f32.mrf.mxu1  ;;  %v4268_v32 = vpack.c.b16 %v1516_v37, %v1515_v22 }
 0x270   : > { %v1281_v41 = vadd.f32 %v1280_v16, %v1192_v48 }
 0x272   : > { %v1330_v18 = vpack.c.bf16 %v1281_v41, %v1014_v63 }
 0x274   : > { %v2276_v26 = vrot.slane %v1330_v18, 4  ;;  %v1517_v22 = vunpack.c.l.b16 %v1330_v18 }
 0x275   : > { %v1193_v55 = vpop.f32.mrf.mxu0 }
 0x276   : > { %v1194_v51 = vadd.f32 %v1193_v55, %v1104_v1  ;;  %v1282_v47 = vpop.f32.mrf.mxu1  ;;  %v4276_v48 = vunpack.c.l.b16 %v2276_v26  ;;  %v1019_v55 = vadd.f32 %v4090_v33, %v4086_v49 }
 0x278   : > { %v1283_v11 = vadd.f32 %v1282_v47, %v1194_v51 }
 0x27a   : > { %v1331_v45 = vpack.c.bf16 %v1283_v11, %v1016_v40  ;;  %v1114_v40 = vpop.f32.mrf.mxu3  ;;  %v5076_v11 = vld [vmem:[#allocation25_spill] sm:$0xff] }
 0x27b   : > { %v1021_v26 = vadd.f32 %v4095_v12, %v5076_v11  ;;  %v1365_v12 = vpop.permute.xlu2 %1364 }
 0x27c   : > { %v1518_v37 = vunpack.c.l.b16 %v1331_v45  ;;  %v2277_v19 = vrot.slane %v1331_v45, 4  ;;  %v1367_v45 = vpop.permute.xlu1 %1366 }
 0x27d   : > { %v1196_v2 = vpop.f32.mrf.mxu0 }
 0x27e   : > { %v4278_v16 = vunpack.c.l.b16 %v2277_v19  ;;  %v1197_v46 = vadd.f32 %v1196_v2, %v1107_v29  ;;  %v1285_v24 = vpop.f32.mrf.mxu1  ;;  %v4280_v41 = vpack.c.b16 %v1518_v37, %v1517_v22  ;;  %v1025_v37 = vpop.f32.mrf.mxu2 }
 0x280   : > { %5075 = vst [vmem:[#allocation8_spill] sm:$0xff] %v4280_v41  ;;  %1529 = vrot.lane.b32.xlu1 %v4280_v41, %s3374_s27  ;;  %v1286_v9 = vadd.f32 %v1285_v24, %v1197_v46  ;;  %v1390_v46 = vsel %vm1370_vm0, %v1367_v45, 0 }
 0x282   : > { %v1369_v1 = vpop.permute.xlu0 %1368  ;;  %v1332_v29 = vpack.c.bf16 %v1286_v9, %v1019_v55 }
 0x283   : > { %v1393_v63 = vsel %vm1370_vm0, %v1369_v1, 0 }
 0x284   : > { %1399 = vmatpush.bf16.xpose.msrb.mxu2 %v1393_v63  ;;  %v2278_v19 = vrot.slane %v1332_v29, 4  ;;  %v1519_v24 = vunpack.c.l.b16 %v1332_v29  ;;  %v1117_v29 = vpop.f32.mrf.mxu3 }
 0x285   : > { %v1198_v18 = vpop.f32.mrf.mxu0 }
 0x286   : > { %v1199_v51 = vadd.f32 %v1198_v18, %v1109_v23  ;;  %v1287_v47 = vpop.f32.mrf.mxu1  ;;  %v4292_v33 = vunpack.c.l.b16 %v2278_v19  ;;  %v1028_v11 = vpop.f32.mrf.mxu2 }
 0x288   : > { %v1288_v22 = vadd.f32 %v1287_v47, %v1199_v51 }
 0x28a   : > { %v1333_v2 = vpack.c.bf16 %v1288_v22, %v1021_v26  ;;  %v1387_v26 = vsel %vm1370_vm0, %v1365_v12, 0  ;;  %v1026_v22 = vadd.f32 %v1025_v37, %v4102_v4  ;;  %v1029_v37 = vadd.f32 %v1028_v11, %v4104_v59 }
 0x28c   : > { %v1520_v1 = vunpack.c.l.b16 %v1333_v2  ;;  %v2279_v50 = vrot.slane %v1333_v2, 4  ;;  %1400 = vmatpush.bf16.xpose.msrb.mxu2 %v1390_v46 }
 0x28d   : > { %v1201_v49 = vpop.f32.mrf.mxu0 }
 0x28e   : > { %v4294_v23 = vunpack.c.l.b16 %v2279_v50  ;;  %v1202_v9 = vadd.f32 %v1201_v49, %v1112_v0  ;;  %v1290_v63 = vpop.f32.mrf.mxu1  ;;  %v4296_v55 = vpack.c.b16 %v1520_v1, %v1519_v24  ;;  %v1119_v24 = vpop.f32.mrf.mxu3 }
 0x290   : > { %5077 = vst [vmem:[#allocation9_spill] sm:$0xff] %v4296_v55  ;;  %v1291_v51 = vadd.f32 %v1290_v63, %v1202_v9  ;;  %1531 = vrot.lane.b32.xlu2 %v4296_v55, %s3374_s27  ;;  %v1030_v63 = vpop.f32.mrf.mxu2 }
 0x292   : > { %v1334_v47 = vpack.c.bf16 %v1291_v51, %v4099_v3 }
 0x294   : > { %1401 = vmatpush.bf16.xpose.msrb.mxu2 %v1387_v26  ;;  %v2357_v2 = vrot.slane %v1334_v47, 4  ;;  %v1594_v1 = vunpack.c.l.b16 %v1334_v47 }
 0x295   : > { %v1203_v50 = vpop.f32.mrf.mxu0 }
 0x296   : > { %v1204_v0 = vadd.f32 %v1203_v50, %v1114_v40  ;;  %v1292_v45 = vpop.f32.mrf.mxu1  ;;  %v4305_v18 = vunpack.c.l.b16 %v2357_v2  ;;  %v1122_v47 = vpop.f32.mrf.mxu3  ;;  %v5078_v2 = vld [vmem:[#allocation26_spill] sm:$0xff] }
 0x298   : > { %v1293_v19 = vadd.f32 %v1292_v45, %v1204_v0 }
 0x29a   : > { %v1335_v46 = vpack.c.bf16 %v1293_v19, %v1026_v22  ;;  %v1033_v19 = vpop.f32.mrf.mxu2 }
 0x29c   : > { %v1595_v49 = vunpack.c.l.b16 %v1335_v46  ;;  %v2358_v9 = vrot.slane %v1335_v46, 4  ;;  %v1031_v46 = vadd.f32 %v1030_v63, %v5078_v2 }
 0x29d   : > { %v1206_v44 = vpop.f32.mrf.mxu0 }
 0x29e   : > { %v4307_v3 = vunpack.c.l.b16 %v2358_v9  ;;  %v1207_v12 = vadd.f32 %v1206_v44, %v1117_v29  ;;  %v1295_v51 = vpop.f32.mrf.mxu1  ;;  %v4309_v26 = vpack.c.b16 %v1595_v49, %v1594_v1 }
 0x2a0   : > { %v1296_v40 = vadd.f32 %v1295_v51, %v1207_v12 }
 0x2a2   : > { %v1336_v0 = vpack.c.bf16 %v1296_v40, %v1029_v37  ;;  %v1035_v40 = vpop.f32.mrf.mxu2 }
 0x2a4   : > { %v2359_v20 = vrot.slane %v1336_v0, 4  ;;  %v1596_v29 = vunpack.c.l.b16 %v1336_v0 }
 0x2a5   : > { %v1208_v50 = vpop.f32.mrf.mxu0 }
 0x2a6   : > { %v1209_v45 = vadd.f32 %v1208_v50, %v1119_v24  ;;  %v1297_v22 = vpop.f32.mrf.mxu1  ;;  %v4315_v36 = vunpack.c.l.b16 %v2359_v20  ;;  %v1124_v24 = vpop.f32.mrf.mxu3  ;;  %v5079_v50 = vld [vmem:[#allocation27_spill] sm:$0xff] }
 0x2a7   : > { %v1034_v0 = vadd.f32 %v1033_v19, %v5079_v50 }
 0x2a8   : > { %v1298_v9 = vadd.f32 %v1297_v22, %v1209_v45 }
 0x2aa   : > { %v1337_v44 = vpack.c.bf16 %v1298_v9, %v1031_v46  ;;  %v5080_v46 = vld [vmem:[#allocation28_spill] sm:$0xff] }
 0x2ac   : > { %v1597_v1 = vunpack.c.l.b16 %v1337_v44  ;;  %v2360_v49 = vrot.slane %v1337_v44, 4 }
 0x2ad   : > { %v1211_v56 = vpop.f32.mrf.mxu0 }
 0x2ae   : > { %v4317_v12 = vunpack.c.l.b16 %v2360_v49  ;;  %v1212_v59 = vadd.f32 %v1211_v56, %v1122_v47  ;;  %v1300_v11 = vpop.f32.mrf.mxu1  ;;  %v4319_v51 = vpack.c.b16 %v1597_v1, %v1596_v29  ;;  %v1036_v56 = vadd.f32 %v1035_v40, %v5080_v46  ;;  %v1127_v9 = vpop.f32.mrf.mxu3 }
 0x2af   : > { %v1038_v1 = vpop.f32.mrf.mxu2 }
 0x2b0   : > { %1608 = vrot.lane.b32.xlu1 %v4319_v51, %s3374_s27  ;;  %v1301_v37 = vadd.f32 %v1300_v11, %v1212_v59 }
 0x2b2   : > { %v1338_v20 = vpack.c.bf16 %v1301_v37, %v1034_v0 }
 0x2b4   : > { %v2361_v44 = vrot.slane %v1338_v20, 4  ;;  %v1598_v49 = vunpack.c.l.b16 %v1338_v20  ;;  %v5081_v20 = vld [vmem:[#allocation29_spill] sm:$0xff] }
 0x2b5   : > { %v1213_v45 = vpop.f32.mrf.mxu0 }
 0x2b6   : > { %v1214_v22 = vadd.f32 %v1213_v45, %v1124_v24  ;;  %v1302_v2 = vpop.f32.mrf.mxu1  ;;  %v4327_v63 = vunpack.c.l.b16 %v2361_v44  ;;  %v1129_v45 = vpop.f32.mrf.mxu3 }
 0x2b8   : > { %v1303_v47 = vadd.f32 %v1302_v2, %v1214_v22  ;;  %v1039_v22 = vadd.f32 %v1038_v1, %v5081_v20 }
 0x2ba   : > { %v1339_v29 = vpack.c.bf16 %v1303_v47, %v1036_v56  ;;  %v5082_v56 = vld [vmem:[#allocation30_spill] sm:$0xff] }
 0x2bc   : > { %v1599_v4 = vunpack.c.l.b16 %v1339_v29  ;;  %v2362_v55 = vrot.slane %v1339_v29, 4 }
 0x2bd   : > { %v1216_v41 = vpop.f32.mrf.mxu0 }
 0x2be   : > { %v4329_v59 = vunpack.c.l.b16 %v2362_v55  ;;  %v1217_v19 = vadd.f32 %v1216_v41, %v1127_v9  ;;  %v1305_v11 = vpop.f32.mrf.mxu1  ;;  %v4331_v37 = vpack.c.b16 %v1599_v4, %v1598_v49  ;;  %v1040_v55 = vpop.f32.mrf.mxu2 }
 0x2bf   : > { %v1041_v47 = vadd.f32 %v1040_v55, %v5082_v56  ;;  %v1449_v9 = vpop.permute.xlu1 %1448  ;;  %v1447_v55 = vpop.permute.xlu2 %1446 }
 0x2c0   : > { %1610 = vrot.lane.b32.xlu2 %v4331_v37, %s3374_s27  ;;  %v2395_v24 = vpack.c.b16 %v4329_v59, %v4327_v63  ;;  %v1306_v40 = vadd.f32 %v1305_v11, %v1217_v19  ;;  %v1471_v1 = vsel %vm1370_vm0, %v1449_v9, 0  ;;  %v5096_v59 = vpack.c.b16 %v4307_v3, %v4305_v18 }
 0x2c2   : > { %v1451_v50 = vpop.permute.xlu0 %1450  ;;  %v1340_v41 = vpack.c.bf16 %v1306_v40, %v1039_v22 }
 0x2c3   : > { %v1474_v0 = vsel %vm1370_vm0, %v1451_v50, 0 }
 0x2c4   : > { %1480 = vmatpush.bf16.xpose.msrb.mxu3 %v1474_v0  ;;  %v2363_v29 = vrot.slane %v1340_v41, 4  ;;  %v1600_v50 = vunpack.c.l.b16 %v1340_v41  ;;  %v1468_v41 = vsel %vm1370_vm0, %v1447_v55, 0 }
 0x2c5   : > { %v1218_v2 = vpop.f32.mrf.mxu0 }
 0x2c6   : > { %v1219_v46 = vadd.f32 %v1218_v2, %v1129_v45  ;;  %v1307_v4 = vpop.f32.mrf.mxu1  ;;  %v4344_v40 = vunpack.c.l.b16 %v2363_v29 }
 0x2c8   : > { %v1308_v44 = vadd.f32 %v1307_v4, %v1219_v46  ;;  %1525 = vrot.lane.b32.xlu2 %v4257_v35, %s3374_s27  ;;  %v1445_v46 = vpop.permute.xlu1 %1444 }
 0x2c9   : > { %v1465_v4 = vsel %vm1370_vm0, %v1445_v46, 0 }
 0x2ca   : > { %v1341_v49 = vpack.c.bf16 %v1308_v44, %v1041_v47  ;;  %v1363_v19 = vpop.permute.xlu0 %1362 }
 0x2cb   : > { %v1384_v11 = vsel %vm1370_vm0, %v1363_v19, 0 }
 0x2cc   : > { %v1601_v0 = vunpack.c.l.b16 %v1341_v49  ;;  %v2364_v20 = vrot.slane %v1341_v49, 4  ;;  %1402 = vmatpush.bf16.xpose.msrb.mxu2 %v1384_v11  ;;  %1481 = vmatpush.bf16.xpose.msrb.mxu3 %v1471_v1  ;;  %v1667_v49 = vlaneseq }
 0x2ce   : > { %v4346_v45 = vunpack.c.l.b16 %v2364_v20  ;;  %v4348_v22 = vpack.c.b16 %v1601_v0, %v1600_v50  ;;  %v4381_v11 = vshrl.u32 %v1667_v49, 7  ;;  %v5083_v50 = vpack.c.b16 %v4175_v8, %v4173_v17 }
 0x2cf   : > { %v5085_v8 = vpack.c.b16 %v4147_v27, %v4143_v15  ;;  %v5087_v15 = vpack.c.b16 %v4134_v38, %v4130_v30  ;;  %v5088_v27 = vpack.c.b16 %v4222_v21, %v4220_v39  ;;  %v5091_v39 = vpack.c.b16 %v4278_v16, %v4276_v48 }
 0x2d0   : > { %v2396_v2 = vpack.c.b16 %v4346_v45, %v4344_v40  ;;  %1612 = vrot.lane.b32.xlu0 %v4348_v22, %s3374_s27  ;;  %v4400_v46 = vadd.s32 8, %v4381_v11  ;;  %v5092_v48 = vpack.c.b16 %v4192_v25, %v4190_v43  ;;  %v5093_v16 = vpack.c.b16 %v4266_v61, %v4264_v28 }
 0x2d1   : > { %v5094_v43 = vpack.c.b16 %v4255_v14, %v4253_v42  ;;  %v5095_v61 = vpack.c.b16 %v4317_v12, %v4315_v36  ;;  %v4507_v12 = vadd.s32 40, %v4381_v11 }
 0x2d3   : > { %2956 = vmatmul.msk.bf16.vlgmr.msrb.gmra.mxu2 %vm1370_vm0, %v4132_v53 }
 0x2d4   : > { %1482 = vmatpush.bf16.xpose.msrb.mxu3 %v1468_v41 }
 0x2d8   : > { %1527 = vrot.lane.b32.xlu0 %v4268_v32, %s3374_s27 }
 0x2dc   : > { %1483 = vmatpush.bf16.xpose.msrb.mxu3 %v1465_v4  ;;  %v5084_v4 = vpack.c.b16 %v4162_v54, %v4158_v6 }
 0x2e0   : > { %1606 = vrot.lane.b32.xlu0 %v4309_v26, %s3374_s27 }
 0x2e3   : > { %2957 = vmatmul.msk.bf16.gmra.mxu2 %vm1370_vm0, %v4145_v60  ;;  %2960 = vmatmul.msk.bf16.vlgmr.msrb.gmra.mxu3 %vm1370_vm0, %v4194_v58 }
 0x2ea   : > { %v1532_v53 = vpop.permute.xlu2 %1531 }
 0x2eb   : > { %v1555_v56 = vsel %vm1370_vm0, %v1532_v53, 0  ;;  %v5086_v53 = vpack.c.b16 %v4240_v7, %v4238_v31  ;;  %v5089_v31 = vpack.c.b16 %v4294_v23, %v4292_v33  ;;  %v5090_v7 = vpack.c.b16 %v4206_v34, %v4204_v5 }
 0x2ec   : > { %1561 = vmatpush.bf16.xpose.msra.mxu2 %v1555_v56  ;;  %v4460_v23 = vadd.s32 24, %v4381_v11 }
 0x2f2   : > { %v1530_v47 = vpop.permute.xlu1 %1529 }
 0x2f3   : > { %v1552_v9 = vsel %vm1370_vm0, %v1530_v47, 0  ;;  %2958 = vmatmul.msk.bf16.gmra.mxu2 %vm1370_vm0, %v4160_v13  ;;  %2961 = vmatmul.msk.bf16.gmra.mxu3 %vm1370_vm0, %v4208_v57 }
 0x2f4   : > { %1562 = vmatpush.bf16.xpose.msra.mxu2 %v1552_v9  ;;  %v4530_v9 = vadd.s32 48, %v4381_v11 }
 0x303   : > { %2959 = vmatmul.msk.bf16.gmra.mxu2 %vm1370_vm0, %v4177_v10  ;;  %2962 = vmatmul.msk.bf16.gmra.mxu3 %vm1370_vm0, %v4224_v52  ;;  %v4383_v52 = vand.u32 127, %v1667_v49 }
 0x305   : > { %vm1678_vm1 = vcmp.le.s32.totalorder %v4383_v52, %v4381_v11  ;;  %vm1679_vm2 = vcmp.le.s32.totalorder %v4383_v52, %v4400_v46  ;;  %vm1681_vm4 = vcmp.le.s32.totalorder %v4383_v52, %v4460_v23  ;;  %vm1683_vm6 = vcmp.le.s32.totalorder %v4383_v52, %v4507_v12 }
 0x306   : > { %vm1684_vm7 = vcmp.le.s32.totalorder %v4383_v52, %v4530_v9 }
 0x313   : > { %2963 = vmatmul.msk.bf16.gmra.mxu3 %vm1370_vm0, %v4242_v62 }
 0x31a   : > { %v1611_v44 = vpop.permute.xlu2 %1610 }
 0x31b   : > { %v1633_v13 = vsel %vm1370_vm0, %v1611_v44, 0 }
 0x322   : > { %v1609_v10 = vpop.permute.xlu1 %1608  ;;  %v1526_v19 = vpop.permute.xlu2 %1525 }
 0x323   : > { %v1630_v62 = vsel %vm1370_vm0, %v1609_v10, 0  ;;  %v1546_v1 = vsel %vm1370_vm0, %v1526_v19, 0 }
 0x342   : > { %v1613_v60 = vpop.permute.xlu0 %1612 }
 0x343   : > { %v1636_v58 = vsel %vm1370_vm0, %v1613_v60, 0 }
 0x344   : > { %1642 = vmatpush.bf16.xpose.msra.mxu3 %v1636_v58 }
 0x34a   : > { %v1528_v29 = vpop.permute.xlu0 %1527 }
 0x34b   : > { %v1549_v57 = vsel %vm1370_vm0, %v1528_v29, 0 }
 0x34c   : > { %1563 = vmatpush.bf16.xpose.msra.mxu2 %v1549_v57  ;;  %1643 = vmatpush.bf16.xpose.msra.mxu3 %v1633_v13  ;;  %v4544_v13 = vadd.s32 56, %v4381_v11  ;;  %v5098_v57 = vld [vmem:[#allocation9_spill] sm:$0xff] }
 0x34e   : > { %vm1685_vm8 = vcmp.le.s32.totalorder %v4383_v52, %v4544_v13 }
 0x352   : > { %v1607_v55 = vpop.permute.xlu0 %1606 }
 0x353   : > { %v1627_v17 = vsel %vm1370_vm0, %v1607_v55, 0 }
 0x354   : > { %1564 = vmatpush.bf16.xpose.msra.mxu2 %v1546_v1  ;;  %1644 = vmatpush.bf16.xpose.msra.mxu3 %v1630_v62 }
 0x356   : > { %v1404_v0 = vpop.f32.mrf.mxu2 }
 0x357   : > { %v4395_v20 = vsel %vm1678_vm1, %v1404_v0, -1e+30 }
 0x358   : > { %v1718_v41 = vsel %vm1370_vm0, %v4395_v20, -inf }
 0x359   : > { %1719 = vmax.xlane.f32.xlu1 %v1718_v41 }
 0x35b   : > { %2964 = vmatmul.msk.bf16.vlgmr.msra.gmra.mxu2 %vm1370_vm0, %v4257_v35  ;;  %v4424_v35 = vadd.s32 16, %v4381_v11 }
 0x35c   : > { %2162 = vmatpush.bf16.msrb.mxu2 %v5083_v50  ;;  %1645 = vmatpush.bf16.xpose.msra.mxu3 %v1627_v17 }
 0x35d   : > { %vm1680_vm3 = vcmp.le.s32.totalorder %v4383_v52, %v4424_v35 }
 0x35e   : > { %v1406_v56 = vpop.f32.mrf.mxu2 }
 0x35f   : > { %v4419_v6 = vsel %vm1679_vm2, %v1406_v56, -1e+30 }
 0x360   : > { %2163 = vmatpush.bf16.msrb.mxu2 %v5084_v4  ;;  %v1721_v54 = vsel %vm1370_vm0, %v4419_v6, -inf }
 0x361   : > { %1722 = vmax.xlane.f32.xlu2 %v1721_v54 }
 0x363   : > { %2968 = vmatmul.msk.bf16.vlgmr.msra.gmra.mxu3 %vm1370_vm0, %v4309_v26 }
 0x364   : > { %2164 = vmatpush.bf16.msrb.mxu2 %v5085_v8  ;;  %2247 = vmatpush.bf16.msrb.mxu3 %v5086_v53 }
 0x366   : > { %v1409_v30 = vpop.f32.mrf.mxu2  ;;  %v1485_v38 = vpop.f32.mrf.mxu3 }
 0x367   : > { %v4448_v21 = vsel %vm1680_vm3, %v1409_v30, -1e+30  ;;  %v4453_v33 = vsel %vm1678_vm1, %v1485_v38, -1e+30 }
 0x368   : > { %2165 = vmatpush.bf16.msrb.mxu2 %v5087_v15  ;;  %2248 = vmatpush.bf16.msrb.mxu3 %v5088_v27  ;;  %v1742_v5 = vsel %vm1370_vm0, %v4453_v33, -inf  ;;  %v1724_v34 = vsel %vm1370_vm0, %v4448_v21, -inf }
 0x369   : > { %1743 = vmax.xlane.f32.xlu0 %v1742_v5  ;;  %1725 = vmax.xlane.f32.xlu1 %v1724_v34 }
 0x36b   : > { %2965 = vmatmul.msk.bf16.gmra.mxu2 %vm1370_vm0, %v4268_v32  ;;  %v4499_v32 = vadd.s32 32, %v4381_v11 }
 0x36c   : > { %2332 = vmatpush.bf16.msra.mxu2 %v5089_v31  ;;  %2249 = vmatpush.bf16.msrb.mxu3 %v5090_v7 }
 0x36d   : > { %vm1682_vm5 = vcmp.le.s32.totalorder %v4383_v52, %v4499_v32 }
 0x36e   : > { %v1411_v26 = vpop.f32.mrf.mxu2  ;;  %v1487_v47 = vpop.f32.mrf.mxu3 }
 0x36f   : > { %v4484_v25 = vsel %vm1681_vm4, %v1411_v26, -1e+30  ;;  %v4496_v42 = vsel %vm1679_vm2, %v1487_v47, -1e+30 }
 0x370   : > { %2333 = vmatpush.bf16.msra.mxu2 %v5091_v39  ;;  %2250 = vmatpush.bf16.msrb.mxu3 %v5092_v48  ;;  %v1727_v28 = vsel %vm1370_vm0, %v4484_v25, -inf  ;;  %v1745_v36 = vsel %vm1370_vm0, %v4496_v42, -inf }
 0x371   : > { %1728 = vmax.xlane.f32.xlu2 %v1727_v28 }
 0x373   : > { %2969 = vmatmul.msk.bf16.gmra.mxu3 %vm1370_vm0, %v4319_v51  ;;  %v5097_v51 = vld [vmem:[#allocation8_spill] sm:$0xff] }
 0x374   : > { %2334 = vmatpush.bf16.msra.mxu2 %v5093_v16  ;;  %2417 = vmatpush.bf16.msra.mxu3 %v2396_v2 }
 0x376   : > { %v1414_v14 = vpop.f32.mrf.mxu2  ;;  %v1490_v63 = vpop.f32.mrf.mxu3 }
 0x377   : > { %v4518_v18 = vsel %vm1682_vm5, %v1414_v14, -1e+30 }
 0x378   : > { %2335 = vmatpush.bf16.msra.mxu2 %v5094_v43  ;;  %2418 = vmatpush.bf16.msra.mxu3 %v2395_v24  ;;  %v1730_v45 = vsel %vm1370_vm0, %v4518_v18, -inf }
 0x379   : > { %1746 = vmax.xlane.f32.xlu2 %v1745_v36 }
 0x37b   : > { %2966 = vmatmul.msk.bf16.gmra.mxu2 %vm1370_vm0, %v5097_v51 }
 0x37c   : > { %2419 = vmatpush.bf16.msra.mxu3 %v5095_v61 }
 0x37e   : > { %v1416_v3 = vpop.f32.mrf.mxu2  ;;  %v1492_v24 = vpop.f32.mrf.mxu3 }
 0x37f   : > { %v4523_v40 = vsel %vm1683_vm6, %v1416_v3, -1e+30  ;;  %v4576_v41 = vsel %vm1681_vm4, %v1492_v24, -1e+30 }
 0x380   : > { %2420 = vmatpush.bf16.msra.mxu3 %v5096_v59  ;;  %v1733_v2 = vsel %vm1370_vm0, %v4523_v40, -inf  ;;  %v1751_v8 = vsel %vm1370_vm0, %v4576_v41, -inf }
 0x381   : > { %1731 = vmax.xlane.f32.xlu2 %v1730_v45  ;;  %1734 = vmax.xlane.f32.xlu0 %v1733_v2 }
 0x383   : > { %2970 = vmatmul.msk.bf16.gmra.mxu3 %vm1370_vm0, %v4331_v37  ;;  %v4553_v37 = vsel %vm1680_vm3, %v1490_v63, -1e+30 }
 0x384   : > { %v1748_v50 = vsel %vm1370_vm0, %v4553_v37, -inf }
 0x386   : > { %v1419_v60 = vpop.f32.mrf.mxu2  ;;  %v1495_v58 = vpop.f32.mrf.mxu3 }
 0x387   : > { %v4539_v44 = vsel %vm1684_vm7, %v1419_v60, -1e+30 }
 0x388   : > { %v1736_v29 = vsel %vm1370_vm0, %v4539_v44, -inf }
 0x389   : > { %1737 = vmax.xlane.f32.xlu0 %v1736_v29 }
 0x38b   : > { %2967 = vmatmul.msk.bf16.gmra.mxu2 %vm1370_vm0, %v5098_v57 }
 0x38e   : > { %v1421_v49 = vpop.f32.mrf.mxu2  ;;  %v1497_v10 = vpop.f32.mrf.mxu3 }
 0x38f   : > { %v4558_v19 = vsel %vm1683_vm6, %v1497_v10, -1e+30  ;;  %v4563_v62 = vsel %vm1685_vm8, %v1421_v49, -1e+30 }
 0x390   : > { %v1757_v1 = vsel %vm1370_vm0, %v4558_v19, -inf  ;;  %v1739_v0 = vsel %vm1370_vm0, %v4563_v62, -inf }
 0x391   : > { %1758 = vmax.xlane.f32.xlu2 %v1757_v1  ;;  %1749 = vmax.xlane.f32.xlu0 %v1748_v50 }
 0x392   : > { %1740 = vmax.xlane.f32.xlu1 %v1739_v0 }
 0x393   : > { %2971 = vmatmul.msk.bf16.gmra.mxu3 %vm1370_vm0, %v4348_v22  ;;  %v4590_v22 = vsel %vm1682_vm5, %v1495_v58, -1e+30 }
 0x394   : > { %v1754_v15 = vsel %vm1370_vm0, %v4590_v22, -inf }
 0x396   : > { %v1500_v55 = vpop.f32.mrf.mxu3 }
 0x397   : > { %v4581_v4 = vsel %vm1684_vm7, %v1500_v55, -1e+30 }
 0x398   : > { %v1760_v17 = vsel %vm1370_vm0, %v4581_v4, -inf }
 0x399   : > { %1761 = vmax.xlane.f32.xlu2 %v1760_v17 }
 0x39a   : > { %1752 = vmax.xlane.f32.xlu1 %v1751_v8 }
 0x39e   : > { %v1502_v53 = vpop.f32.mrf.mxu3 }
 0x39f   : > { %v4595_v56 = vsel %vm1685_vm8, %v1502_v53, -1e+30 }
 0x3a0   : > { %v1763_v54 = vsel %vm1370_vm0, %v4595_v56, -inf }
 0x3a1   : > { %1764 = vmax.xlane.f32.xlu0 %v1763_v54 }
 0x3a2   : > { %1755 = vmax.xlane.f32.xlu1 %v1754_v15 }
 0x3cc   : > { %v1720_v27 = vpop.xlane.xlu1 %1719 }
 0x3cd   : > { %v1814_v31 = vsub.f32 %v4395_v20, %v1720_v27 }
 0x3cf   : > { %v1846_v7 = vmul.f32 1.442695, %v1814_v31 }
 0x3d1   : > { %3146 = vpow2.f32 %v1846_v7 }
 0x3d4   : > { %v1723_v30 = vpop.xlane.xlu2 %1722 }
 0x3d5   : > { %v1815_v39 = vsub.f32 %v4419_v6, %v1723_v30 }
 0x3d7   : > { %v4602_v38 = vpop.eup %3146  ;;  %v1848_v34 = vmul.f32 1.442695, %v1815_v39 }
 0x3d8   : > { %v1910_v5 = vsel %vm1370_vm0, %v4602_v38, 0.0 }
 0x3d9   : > { %1911 = vadd.xlane.f32.xlu1 %v1910_v5  ;;  %3148 = vpow2.f32 %v1848_v34 }
 0x3dc   : > { %v1726_v48 = vpop.xlane.xlu1 %1725  ;;  %v1744_v61 = vpop.xlane.xlu0 %1743 }
 0x3dd   : > { %v1816_v26 = vsub.f32 %v4448_v21, %v1726_v48  ;;  %v1822_v36 = vsub.f32 %v4453_v33, %v1744_v61 }
 0x3de   : > { %v1566_v16 = vpop.f32.mrf.mxu2 }
 0x3df   : > { %v4611_v20 = vsel %vm1678_vm1, %v1566_v16, -1e+30  ;;  %v1850_v6 = vmul.f32 1.442695, %v1816_v26  ;;  %v4615_v28 = vpop.eup %3148 }
 0x3e0   : > { %v1766_v47 = vsel %vm1370_vm0, %v4611_v20, -inf  ;;  %v1913_v51 = vsel %vm1370_vm0, %v4615_v28, 0.0 }
 0x3e1   : > { %1767 = vmax.xlane.f32.xlu2 %v1766_v47  ;;  %3150 = vpow2.f32 %v1850_v6 }
 0x3e4   : > { %v1729_v43 = vpop.xlane.xlu2 %1728 }
 0x3e5   : > { %v1817_v14 = vsub.f32 %v4484_v25, %v1729_v43  ;;  %v1862_v25 = vmul.f32 1.442695, %v1822_v36 }
 0x3e6   : > { %v1568_v63 = vpop.f32.mrf.mxu2  ;;  %v1647_v24 = vpop.f32.mrf.mxu3 }
 0x3e7   : > { %v1852_v59 = vmul.f32 1.442695, %v1817_v14  ;;  %v4621_v21 = vsel %vm1679_vm2, %v1568_v63, -1e+30  ;;  %v4628_v2 = vpop.eup %3150  ;;  %v4640_v50 = vsel %vm1678_vm1, %v1647_v24, -1e+30 }
 0x3e8   : > { %v1769_v3 = vsel %vm1370_vm0, %v4621_v21, -inf  ;;  %v1916_v57 = vsel %vm1370_vm0, %v4628_v2, 0.0 }
 0x3e9   : > { %3152 = vpow2.f32 %v1852_v59  ;;  %1914 = vadd.xlane.f32.xlu2 %v1913_v51  ;;  %1770 = vmax.xlane.f32.xlu0 %v1769_v3 }
 0x3ea   : > { %3154 = vpow2.f32 %v1862_v25 }
 0x3ec   : > { %v1747_v45 = vpop.xlane.xlu2 %1746 }
 0x3ed   : > { %v1823_v29 = vsub.f32 %v4496_v42, %v1747_v45 }
 0x3ee   : > { %v1571_v60 = vpop.f32.mrf.mxu2  ;;  %v1649_v17 = vpop.f32.mrf.mxu3 }
 0x3ef   : > { %v4630_v58 = vpop.eup %3152  ;;  %v1864_v49 = vmul.f32 1.442695, %v1823_v29  ;;  %v4672_v47 = vsel %vm1680_vm3, %v1571_v60, -1e+30  ;;  %v4677_v6 = vsel %vm1679_vm2, %v1649_v17, -1e+30 }
 0x3f0   : > { %v1919_v33 = vsel %vm1370_vm0, %v4630_v58, 0.0  ;;  %v4644_v55 = vpop.eup %3154  ;;  %v1772_v59 = vsel %vm1370_vm0, %v4672_v47, -inf  ;;  %v1793_v36 = vsel %vm1370_vm0, %v4677_v6, -inf }
 0x3f1   : > { %1920 = vadd.xlane.f32.xlu1 %v1919_v33  ;;  %1917 = vadd.xlane.f32.xlu0 %v1916_v57  ;;  %3156 = vpow2.f32 %v1864_v49 }
 0x3f4   : > { %v1732_v10 = vpop.xlane.xlu2 %1731  ;;  %v1735_v1 = vpop.xlane.xlu0 %1734 }
 0x3f5   : > { %v1818_v0 = vsub.f32 %v4518_v18, %v1732_v10  ;;  %v1819_v42 = vsub.f32 %v4523_v40, %v1735_v1  ;;  %v1790_v18 = vsel %vm1370_vm0, %v4640_v50, -inf  ;;  %v1934_v40 = vsel %vm1370_vm0, %v4644_v55, 0.0 }
 0x3f6   : > { %v1573_v8 = vpop.f32.mrf.mxu2  ;;  %v1652_v39 = vpop.f32.mrf.mxu3 }
 0x3f7   : > { %v1854_v53 = vmul.f32 1.442695, %v1818_v0  ;;  %v1856_v54 = vmul.f32 1.442695, %v1819_v42  ;;  %v4649_v15 = vsel %vm1681_vm4, %v1573_v8, -1e+30  ;;  %v4657_v31 = vpop.eup %3156 }
 0x3f8   : > { %v1775_v11 = vsel %vm1370_vm0, %v4649_v15, -inf  ;;  %v1937_v48 = vsel %vm1370_vm0, %v4657_v31, 0.0  ;;  %v4683_v14 = vsel %vm1680_vm3, %v1652_v39, -1e+30 }
 0x3f9   : > { %3158 = vpow2.f32 %v1854_v53  ;;  %1776 = vmax.xlane.f32.xlu2 %v1775_v11  ;;  %1791 = vmax.xlane.f32.xlu1 %v1790_v18  ;;  %v1796_v46 = vsel %vm1370_vm0, %v4683_v14, -inf }
 0x3fa   : > { %3160 = vpow2.f32 %v1856_v54  ;;  %1935 = vadd.xlane.f32.xlu0 %v1934_v40 }
 0x3fc   : > { %v1738_v27 = vpop.xlane.xlu0 %1737 }
 0x3fd   : > { %v1820_v17 = vsub.f32 %v4539_v44, %v1738_v27 }
 0x3fe   : > { %v1576_v5 = vpop.f32.mrf.mxu2  ;;  %v1654_v51 = vpop.f32.mrf.mxu3 }
 0x3ff   : > { %v4659_v7 = vpop.eup %3158  ;;  %v4707_v10 = vsel %vm1681_vm4, %v1654_v51, -1e+30  ;;  %v1858_v18 = vmul.f32 1.442695, %v1820_v17  ;;  %v4728_v27 = vsel %vm1682_vm5, %v1576_v5, -1e+30 }
 0x400   : > { %v4661_v30 = vpop.eup %3160  ;;  %v1922_v34 = vsel %vm1370_vm0, %v4659_v7, 0.0  ;;  %v1799_v53 = vsel %vm1370_vm0, %v4707_v10, -inf }
 0x401   : > { %1923 = vadd.xlane.f32.xlu2 %v1922_v34  ;;  %1938 = vadd.xlane.f32.xlu1 %v1937_v48  ;;  %v1925_v16 = vsel %vm1370_vm0, %v4661_v30, 0.0 }
 0x402   : > { %1926 = vadd.xlane.f32.xlu0 %v1925_v16 }
 0x404   : > { %v1750_v26 = vpop.xlane.xlu0 %1749  ;;  %v1759_v25 = vpop.xlane.xlu2 %1758 }
 0x405   : > { %v1741_v43 = vpop.xlane.xlu1 %1740  ;;  %v1824_v61 = vsub.f32 %v4553_v37, %v1750_v26  ;;  %v1827_v33 = vsub.f32 %v4558_v19, %v1759_v25  ;;  %v1778_v26 = vsel %vm1370_vm0, %v4728_v27, -inf }
 0x406   : > { %v1578_v3 = vpop.f32.mrf.mxu2  ;;  %v1657_v49 = vpop.f32.mrf.mxu3  ;;  %v1821_v23 = vsub.f32 %v4563_v62, %v1741_v43 }
 0x407   : > { %v1866_v63 = vmul.f32 1.442695, %v1824_v61  ;;  %v4694_v35 = vsel %vm1683_vm6, %v1578_v3, -1e+30  ;;  %v4713_v19 = vsel %vm1682_vm5, %v1657_v49, -1e+30 }
 0x408   : > { %v1781_v60 = vsel %vm1370_vm0, %v4694_v35, -inf  ;;  %v1802_v11 = vsel %vm1370_vm0, %v4713_v19, -inf  ;;  %v1860_v44 = vmul.f32 1.442695, %v1821_v23 }
 0x409   : > { %1773 = vmax.xlane.f32.xlu1 %v1772_v59  ;;  %1794 = vmax.xlane.f32.xlu2 %v1793_v36  ;;  %3162 = vpow2.f32 %v1866_v63 }
 0x40a   : > { %1797 = vmax.xlane.f32.xlu0 %v1796_v46 }
 0x40c   : > { %v1762_v61 = vpop.xlane.xlu2 %1761 }
 0x40d   : > { %v1753_v37 = vpop.xlane.xlu1 %1752  ;;  %v1828_v36 = vsub.f32 %v4581_v4, %v1762_v61 }
 0x40e   : > { %v1825_v24 = vsub.f32 %v4576_v41, %v1753_v37  ;;  %v1872_v41 = vmul.f32 1.442695, %v1827_v33  ;;  %v1581_v54 = vpop.f32.mrf.mxu2  ;;  %v1659_v34 = vpop.f32.mrf.mxu3 }
 0x40f   : > { %v4699_v29 = vpop.eup %3162  ;;  %v1874_v25 = vmul.f32 1.442695, %v1828_v36  ;;  %v4762_v4 = vsel %vm1683_vm6, %v1659_v34, -1e+30 }
 0x410   : > { %v1868_v45 = vmul.f32 1.442695, %v1825_v24  ;;  %v1940_v57 = vsel %vm1370_vm0, %v4699_v29, 0.0 }
 0x411   : > { %1782 = vmax.xlane.f32.xlu1 %v1781_v60  ;;  %1941 = vadd.xlane.f32.xlu2 %v1940_v57  ;;  %v1805_v60 = vsel %vm1370_vm0, %v4762_v4, -inf }
 0x412   : > { %3164 = vpow2.f32 %v1868_v45  ;;  %v4767_v45 = vsel %vm1684_vm7, %v1581_v54, -1e+30 }
 0x413   : > { %3166 = vpow2.f32 %v1872_v41  ;;  %v1784_v57 = vsel %vm1370_vm0, %v4767_v45, -inf }
 0x414   : > { %v1765_v40 = vpop.xlane.xlu0 %1764 }
 0x415   : > { %v1756_v1 = vpop.xlane.xlu1 %1755  ;;  %v1829_v48 = vsub.f32 %v4595_v56, %v1765_v40 }
 0x416   : > { %v1826_v0 = vsub.f32 %v4590_v22, %v1756_v1  ;;  %v1583_v5 = vpop.f32.mrf.mxu2  ;;  %v1662_v3 = vpop.f32.mrf.mxu3 }
 0x417   : > { %v1876_v43 = vmul.f32 1.442695, %v1829_v48  ;;  %v4746_v56 = vsel %vm1685_vm8, %v1583_v5, -1e+30  ;;  %v4780_v41 = vsel %vm1684_vm7, %v1662_v3, -1e+30 }
 0x418   : > { %v4715_v42 = vpop.eup %3164  ;;  %v1870_v8 = vmul.f32 1.442695, %v1826_v0  ;;  %v1787_v46 = vsel %vm1370_vm0, %v4746_v56, -inf  ;;  %v1808_v17 = vsel %vm1370_vm0, %v4780_v41, -inf }
 0x419   : > { %1800 = vmax.xlane.f32.xlu1 %v1799_v53  ;;  %v1943_v22 = vsel %vm1370_vm0, %v4715_v42, 0.0  ;;  %1803 = vmax.xlane.f32.xlu2 %v1802_v11  ;;  %v4730_v62 = vpop.eup %3166 }
 0x41a   : > { %3168 = vpow2.f32 %v1870_v8  ;;  %1944 = vadd.xlane.f32.xlu0 %v1943_v22  ;;  %v1949_v32 = vsel %vm1370_vm0, %v4730_v62, 0.0 }
 0x41b   : > { %3170 = vpow2.f32 %v1858_v18 }
 0x41c   : > { %3172 = vpow2.f32 %v1860_v44 }
 0x41d   : > { %3174 = vpow2.f32 %v1876_v43 }
 0x41e   : > { %3176 = vpow2.f32 %v1874_v25  ;;  %v1664_v12 = vpop.f32.mrf.mxu3 }
 0x41f   : > { %v4785_v1 = vsel %vm1685_vm8, %v1664_v12, -1e+30 }
 0x420   : > { %v4732_v39 = vpop.eup %3168  ;;  %v1811_v8 = vsel %vm1370_vm0, %v4785_v1, -inf }
 0x421   : > { %v1946_v16 = vsel %vm1370_vm0, %v4732_v39, 0.0  ;;  %1950 = vadd.xlane.f32.xlu2 %v1949_v32  ;;  %v4741_v63 = vpop.eup %3170 }
 0x422   : > { %1947 = vadd.xlane.f32.xlu1 %v1946_v16  ;;  %1779 = vmax.xlane.f32.xlu0 %v1778_v26  ;;  %v4748_v59 = vpop.eup %3172  ;;  %v1928_v51 = vsel %vm1370_vm0, %v4741_v63, 0.0 }
 0x423   : > { %v1931_v37 = vsel %vm1370_vm0, %v4748_v59, 0.0  ;;  %v4757_v24 = vpop.eup %3174 }
 0x424   : > { %v1955_v33 = vsel %vm1370_vm0, %v4757_v24, 0.0  ;;  %v4775_v49 = vpop.eup %3176 }
 0x425   : > { %v1952_v0 = vsel %vm1370_vm0, %v4775_v49, 0.0 }
 0x429   : > { %1932 = vadd.xlane.f32.xlu2 %v1931_v37 }
 0x42a   : > { %1788 = vmax.xlane.f32.xlu0 %v1787_v46  ;;  %1929 = vadd.xlane.f32.xlu1 %v1928_v51 }
 0x431   : > { %1785 = vmax.xlane.f32.xlu2 %v1784_v57 }
 0x432   : > { %1806 = vmax.xlane.f32.xlu0 %v1805_v60  ;;  %1956 = vadd.xlane.f32.xlu1 %v1955_v33 }
 0x439   : > { %1812 = vmax.xlane.f32.xlu2 %v1811_v8 }
 0x43a   : > { %1953 = vadd.xlane.f32.xlu0 %v1952_v0  ;;  %1809 = vmax.xlane.f32.xlu1 %v1808_v17 }
 0x44c   : > { %v1912_v9 = vpop.xlane.xlu1 %1911 }
 0x44d   : > { %3178 = vrcp.f32 %v1912_v9 }
 0x453   : > { %v3179_v22 = vpop.eup %3178 }
 0x454   : > { %v1768_v53 = vpop.xlane.xlu2 %1767  ;;  %v2038_v40 = vmul.f32 %v3179_v22, %v4602_v38 }
 0x455   : > { %v1830_v23 = vsub.f32 %v4611_v20, %v1768_v53 }
 0x456   : > { %v2070_v48 = vpack.c.bf16 %v2038_v40, %v2038_v40 }
 0x457   : > { %v1878_v52 = vmul.f32 1.442695, %v1830_v23 }
 0x458   : > { %v2118_v43 = vunpack.c.l.b16 %v2070_v48 }
 0x459   : > { %3180 = vpow2.f32 %v1878_v52 }
 0x45c   : > { %v1915_v13 = vpop.xlane.xlu2 %1914  ;;  %v1771_v54 = vpop.xlane.xlu0 %1770 }
 0x45d   : > { %3182 = vrcp.f32 %v1915_v13  ;;  %v1831_v11 = vsub.f32 %v4621_v21, %v1771_v54 }
 0x45f   : > { %v4795_v18 = vpop.eup %3180  ;;  %v1880_v44 = vmul.f32 1.442695, %v1831_v11 }
 0x460   : > { %v1958_v34 = vsel %vm1370_vm0, %v4795_v18, 0.0 }
 0x461   : > { %3184 = vpow2.f32 %v1880_v44  ;;  %1959 = vadd.xlane.f32.xlu0 %v1958_v34 }
 0x463   : > { %v3183_v20 = vpop.eup %3182 }
 0x464   : > { %v2039_v16 = vmul.f32 %v3183_v20, %v4615_v28  ;;  %v1921_v26 = vpop.xlane.xlu1 %1920  ;;  %v1918_v32 = vpop.xlane.xlu0 %1917 }
 0x465   : > { %3186 = vrcp.f32 %v1921_v26 }
 0x466   : > { %v2071_v5 = vpack.c.bf16 %v2039_v16, %v2039_v16  ;;  %3188 = vrcp.f32 %v1918_v32 }
 0x467   : > { %v4801_v21 = vpop.eup %3184 }
 0x468   : > { %v2119_v61 = vunpack.c.l.b16 %v2071_v5  ;;  %v1961_v38 = vsel %vm1370_vm0, %v4801_v21, 0.0 }
 0x469   : > { %1962 = vadd.xlane.f32.xlu1 %v1961_v38 }
 0x46a   : > { %v2126_v36 = vpack.c.b16 %v2119_v61, %v2118_v43 }
 0x46b   : > { %v3187_v46 = vpop.eup %3186 }
 0x46c   : > { %v3189_v51 = vpop.eup %3188  ;;  %2972 = vmatmul.msk.bf16.vlgmr.msrb.gmra.mxu2 %vm1370_vm0, %v2126_v36  ;;  %v1777_v3 = vpop.xlane.xlu2 %1776  ;;  %v2041_v60 = vmul.f32 %v3187_v46, %v4630_v58 }
 0x46d   : > { %v1792_v28 = vpop.xlane.xlu1 %1791  ;;  %v1936_v25 = vpop.xlane.xlu0 %1935  ;;  %v2040_v33 = vmul.f32 %v3189_v51, %v4628_v2  ;;  %v1833_v12 = vsub.f32 %v4649_v15, %v1777_v3 }
 0x46e   : > { %v1838_v37 = vsub.f32 %v4640_v50, %v1792_v28  ;;  %3190 = vrcp.f32 %v1936_v25  ;;  %v2073_v0 = vpack.c.bf16 %v2041_v60, %v2041_v60 }
 0x46f   : > { %v2072_v17 = vpack.c.bf16 %v2040_v33, %v2040_v33  ;;  %v1884_v8 = vmul.f32 1.442695, %v1833_v12 }
 0x470   : > { %v1894_v57 = vmul.f32 1.442695, %v1838_v37  ;;  %v2121_v13 = vunpack.c.l.b16 %v2073_v0 }
 0x471   : > { %v2120_v50 = vunpack.c.l.b16 %v2072_v17 }
 0x472   : > { %3192 = vpow2.f32 %v1894_v57 }
 0x473   : > { %v2127_v54 = vpack.c.b16 %v2121_v13, %v2120_v50 }
 0x474   : > { %v1924_v9 = vpop.xlane.xlu2 %1923  ;;  %v3191_v52 = vpop.eup %3190 }
 0x475   : > { %v1939_v53 = vpop.xlane.xlu1 %1938  ;;  %3194 = vrcp.f32 %v1924_v9  ;;  %v1927_v23 = vpop.xlane.xlu0 %1926  ;;  %v2046_v2 = vmul.f32 %v3191_v52, %v4644_v55 }
 0x476   : > { %3196 = vrcp.f32 %v1939_v53 }
 0x477   : > { %3198 = vrcp.f32 %v1927_v23  ;;  %v2078_v20 = vpack.c.bf16 %v2046_v2, %v2046_v2 }
 0x478   : > { %v4810_v58 = vpop.eup %3192  ;;  %3200 = vpow2.f32 %v1884_v8 }
 0x479   : > { %v1982_v15 = vsel %vm1370_vm0, %v4810_v58, 0.0  ;;  %v2203_v51 = vunpack.c.l.b16 %v2078_v20 }
 0x47a   : > { %1983 = vadd.xlane.f32.xlu2 %v1982_v15 }
 0x47b   : > { %v3195_v22 = vpop.eup %3194 }
 0x47c   : > { %v3197_v11 = vpop.eup %3196  ;;  %v1795_v40 = vpop.xlane.xlu2 %1794  ;;  %2973 = vmatmul.msk.bf16.gmra.mxu2 %vm1370_vm0, %v2127_v54  ;;  %v2042_v5 = vmul.f32 %v3195_v22, %v4659_v7 }
 0x47d   : > { %v1774_v44 = vpop.xlane.xlu1 %1773  ;;  %v3199_v34 = vpop.eup %3198  ;;  %v2047_v48 = vmul.f32 %v3197_v11, %v4657_v31  ;;  %v1839_v26 = vsub.f32 %v4677_v6, %v1795_v40 }
 0x47e   : > { %v1832_v16 = vsub.f32 %v4672_v47, %v1774_v44  ;;  %v1798_v55 = vpop.xlane.xlu0 %1797  ;;  %v4819_v32 = vpop.eup %3200  ;;  %v2043_v43 = vmul.f32 %v3199_v34, %v4661_v30  ;;  %v2074_v47 = vpack.c.bf16 %v2042_v5, %v2042_v5 }
 0x47f   : > { %v2079_v61 = vpack.c.bf16 %v2047_v48, %v2047_v48  ;;  %v1896_v36 = vmul.f32 1.442695, %v1839_v26  ;;  %v1840_v46 = vsub.f32 %v4683_v14, %v1798_v55  ;;  %v1967_v31 = vsel %vm1370_vm0, %v4819_v32, 0.0 }
 0x480   : > { %v1882_v38 = vmul.f32 1.442695, %v1832_v16  ;;  %v2075_v6 = vpack.c.bf16 %v2043_v43, %v2043_v43  ;;  %v2122_v30 = vunpack.c.l.b16 %v2074_v47 }
 0x481   : > { %v2204_v3 = vunpack.c.l.b16 %v2079_v61  ;;  %v1898_v37 = vmul.f32 1.442695, %v1840_v46 }
 0x482   : > { %3202 = vpow2.f32 %v1882_v38  ;;  %1968 = vadd.xlane.f32.xlu2 %v1967_v31  ;;  %v2123_v25 = vunpack.c.l.b16 %v2075_v6 }
 0x483   : > { %3204 = vpow2.f32 %v1896_v36  ;;  %v2211_v28 = vpack.c.b16 %v2204_v3, %v2203_v51 }
 0x484   : > { %v1942_v60 = vpop.xlane.xlu2 %1941  ;;  %3206 = vpow2.f32 %v1898_v37  ;;  %v2128_v17 = vpack.c.b16 %v2123_v25, %v2122_v30 }
 0x485   : > { %v1783_v7 = vpop.xlane.xlu1 %1782  ;;  %2976 = vmatmul.msk.bf16.vlgmr.msrb.gmra.mxu3 %vm1370_vm0, %v2211_v28  ;;  %3208 = vrcp.f32 %v1942_v60 }
 0x486   : > { %v1835_v57 = vsub.f32 %v4694_v35, %v1783_v7 }
 0x488   : > { %v4827_v33 = vpop.eup %3202  ;;  %v1888_v8 = vmul.f32 1.442695, %v1835_v57 }
 0x489   : > { %v4829_v14 = vpop.eup %3204  ;;  %v1964_v12 = vsel %vm1370_vm0, %v4827_v33, 0.0 }
 0x48a   : > { %v1985_v0 = vsel %vm1370_vm0, %v4829_v14, 0.0  ;;  %1965 = vadd.xlane.f32.xlu1 %v1964_v12  ;;  %v4837_v53 = vpop.eup %3206 }
 0x48b   : > { %1986 = vadd.xlane.f32.xlu0 %v1985_v0  ;;  %v3209_v35 = vpop.eup %3208  ;;  %v1988_v22 = vsel %vm1370_vm0, %v4837_v53, 0.0 }
 0x48c   : > { %2974 = vmatmul.msk.bf16.gmra.mxu2 %vm1370_vm0, %v2128_v17  ;;  %v1804_v13 = vpop.xlane.xlu2 %1803  ;;  %v2048_v15 = vmul.f32 %v3209_v35, %v4699_v29 }
 0x48d   : > { %v1801_v9 = vpop.xlane.xlu1 %1800  ;;  %v1945_v52 = vpop.xlane.xlu0 %1944  ;;  %v1842_v2 = vsub.f32 %v4713_v19, %v1804_v13 }
 0x48e   : > { %v1841_v23 = vsub.f32 %v4707_v10, %v1801_v9  ;;  %3210 = vrcp.f32 %v1945_v52  ;;  %v2080_v44 = vpack.c.bf16 %v2048_v15, %v2048_v15 }
 0x48f   : > { %3212 = vpow2.f32 %v1888_v8  ;;  %v1902_v54 = vmul.f32 1.442695, %v1842_v2 }
 0x490   : > { %v1900_v50 = vmul.f32 1.442695, %v1841_v23  ;;  %v2205_v5 = vunpack.c.l.b16 %v2080_v44 }
 0x492   : > { %3214 = vpow2.f32 %v1900_v50 }
 0x493   : > { %1989 = vadd.xlane.f32.xlu0 %v1988_v22  ;;  %3216 = vpow2.f32 %v1902_v54 }
 0x494   : > { %v3211_v11 = vpop.eup %3210  ;;  %v1951_v19 = vpop.xlane.xlu2 %1950 }
 0x495   : > { %v2049_v10 = vmul.f32 %v3211_v11, %v4715_v42  ;;  %v1948_v40 = vpop.xlane.xlu1 %1947  ;;  %v1780_v34 = vpop.xlane.xlu0 %1779 }
 0x496   : > { %v4845_v20 = vpop.eup %3212  ;;  %3218 = vrcp.f32 %v1948_v40  ;;  %v1834_v48 = vsub.f32 %v4728_v27, %v1780_v34 }
 0x497   : > { %v2081_v16 = vpack.c.bf16 %v2049_v10, %v2049_v10  ;;  %3220 = vrcp.f32 %v1951_v19  ;;  %v1973_v42 = vsel %vm1370_vm0, %v4845_v20, 0.0 }
 0x498   : > { %v4848_v29 = vpop.eup %3214  ;;  %v1886_v26 = vmul.f32 1.442695, %v1834_v48 }
 0x499   : > { %v1991_v55 = vsel %vm1370_vm0, %v4848_v29, 0.0  ;;  %v2206_v43 = vunpack.c.l.b16 %v2081_v16  ;;  %v4854_v61 = vpop.eup %3216 }
 0x49a   : > { %1992 = vadd.xlane.f32.xlu1 %v1991_v55  ;;  %3222 = vpow2.f32 %v1886_v26  ;;  %v1994_v7 = vsel %vm1370_vm0, %v4854_v61, 0.0 }
 0x49b   : > { %1974 = vadd.xlane.f32.xlu0 %v1973_v42  ;;  %v2212_v38 = vpack.c.b16 %v2206_v43, %v2205_v5 }
 0x49c   : > { %v3219_v27 = vpop.eup %3218  ;;  %v1933_v3 = vpop.xlane.xlu2 %1932 }
 0x49d   : > { %v3221_v36 = vpop.eup %3220  ;;  %v1930_v46 = vpop.xlane.xlu1 %1929  ;;  %2977 = vmatmul.msk.bf16.gmra.mxu3 %vm1370_vm0, %v2212_v38  ;;  %v2050_v47 = vmul.f32 %v3219_v27, %v4732_v39 }
 0x49e   : > { %v1789_v51 = vpop.xlane.xlu0 %1788  ;;  %3224 = vrcp.f32 %v1930_v46  ;;  %v2051_v6 = vmul.f32 %v3221_v36, %v4730_v62 }
 0x49f   : > { %v1837_v31 = vsub.f32 %v4746_v56, %v1789_v51  ;;  %3226 = vrcp.f32 %v1933_v3  ;;  %v2082_v25 = vpack.c.bf16 %v2050_v47, %v2050_v47 }
 0x4a0   : > { %v4860_v28 = vpop.eup %3222  ;;  %v2083_v60 = vpack.c.bf16 %v2051_v6, %v2051_v6 }
 0x4a1   : > { %v1892_v37 = vmul.f32 1.442695, %v1837_v31  ;;  %v1970_v30 = vsel %vm1370_vm0, %v4860_v28, 0.0  ;;  %v2207_v9 = vunpack.c.l.b16 %v2082_v25 }
 0x4a2   : > { %1995 = vadd.xlane.f32.xlu1 %v1994_v7  ;;  %1971 = vadd.xlane.f32.xlu2 %v1970_v30  ;;  %v2208_v23 = vunpack.c.l.b16 %v2083_v60 }
 0x4a3   : > { %3228 = vpow2.f32 %v1892_v37 }
 0x4a4   : > { %v3225_v56 = vpop.eup %3224  ;;  %v1786_v17 = vpop.xlane.xlu2 %1785 }
 0x4a5   : > { %v3227_v57 = vpop.eup %3226  ;;  %v2044_v39 = vmul.f32 %v3225_v56, %v4741_v63  ;;  %v1957_v62 = vpop.xlane.xlu1 %1956  ;;  %v1836_v35 = vsub.f32 %v4767_v45, %v1786_v17 }
 0x4a6   : > { %v1807_v12 = vpop.xlane.xlu0 %1806  ;;  %v2045_v0 = vmul.f32 %v3227_v57, %v4748_v59  ;;  %3230 = vrcp.f32 %v1957_v62  ;;  %v2213_v59 = vpack.c.b16 %v2208_v23, %v2207_v9 }
 0x4a7   : > { %v1843_v8 = vsub.f32 %v4762_v4, %v1807_v12  ;;  %v2076_v52 = vpack.c.bf16 %v2044_v39, %v2044_v39  ;;  %v1890_v54 = vmul.f32 1.442695, %v1836_v35 }
 0x4a8   : > { %v2077_v50 = vpack.c.bf16 %v2045_v0, %v2045_v0 }
 0x4a9   : > { %v4870_v13 = vpop.eup %3228  ;;  %v1904_v2 = vmul.f32 1.442695, %v1843_v8  ;;  %v2124_v15 = vunpack.c.l.b16 %v2076_v52 }
 0x4aa   : > { %v1979_v63 = vsel %vm1370_vm0, %v4870_v13, 0.0  ;;  %v2125_v22 = vunpack.c.l.b16 %v2077_v50 }
 0x4ab   : > { %3232 = vpow2.f32 %v1904_v2  ;;  %1980 = vadd.xlane.f32.xlu1 %v1979_v63 }
 0x4ac   : > { %3234 = vpow2.f32 %v1890_v54  ;;  %v2129_v4 = vpack.c.b16 %v2125_v22, %v2124_v15  ;;  %v3231_v44 = vpop.eup %3230  ;;  %v1813_v10 = vpop.xlane.xlu2 %1812 }
 0x4ad   : > { %v1810_v11 = vpop.xlane.xlu1 %1809  ;;  %2978 = vmatmul.msk.bf16.gmra.mxu3 %vm1370_vm0, %v2213_v59  ;;  %v1845_v34 = vsub.f32 %v4785_v1, %v1813_v10  ;;  %v2053_v26 = vmul.f32 %v3231_v44, %v4757_v24 }
 0x4ae   : > { %v1954_v45 = vpop.xlane.xlu0 %1953  ;;  %v1844_v40 = vsub.f32 %v4780_v41, %v1810_v11  ;;  %2975 = vmatmul.msk.bf16.gmra.mxu2 %vm1370_vm0, %v2129_v4 }
 0x4af   : > { %3236 = vrcp.f32 %v1954_v45  ;;  %v1908_v55 = vmul.f32 1.442695, %v1845_v34  ;;  %v2085_v1 = vpack.c.bf16 %v2053_v26, %v2053_v26 }
 0x4b0   : > { %v1906_v48 = vmul.f32 1.442695, %v1844_v40 }
 0x4b1   : > { %v4878_v19 = vpop.eup %3232  ;;  %v2210_v24 = vunpack.c.l.b16 %v2085_v1 }
 0x4b2   : > { %v4880_v16 = vpop.eup %3234  ;;  %v1997_v5 = vsel %vm1370_vm0, %v4878_v19, 0.0  ;;  %3238 = vpow2.f32 %v1906_v48 }
 0x4b3   : > { %v1976_v41 = vsel %vm1370_vm0, %v4880_v16, 0.0  ;;  %1998 = vadd.xlane.f32.xlu2 %v1997_v5  ;;  %3240 = vpow2.f32 %v1908_v55 }
 0x4b4   : > { %1977 = vadd.xlane.f32.xlu0 %v1976_v41 }
 0x4b5   : > { %v3237_v43 = vpop.eup %3236 }
 0x4b6   : > { %v2052_v42 = vmul.f32 %v3237_v43, %v4775_v49 }
 0x4b8   : > { %v2084_v38 = vpack.c.bf16 %v2052_v42, %v2052_v42  ;;  %v4888_v27 = vpop.eup %3238 }
 0x4b9   : > { %v4890_v36 = vpop.eup %3240  ;;  %v2000_v51 = vsel %vm1370_vm0, %v4888_v27, 0.0 }
 0x4ba   : > { %v2209_v46 = vunpack.c.l.b16 %v2084_v38  ;;  %v2003_v3 = vsel %vm1370_vm0, %v4890_v36, 0.0 }
 0x4bb   : > { %2001 = vadd.xlane.f32.xlu2 %v2000_v51 }
 0x4bc   : > { %2004 = vadd.xlane.f32.xlu0 %v2003_v3  ;;  %v2214_v31 = vpack.c.b16 %v2210_v24, %v2209_v46 }
 0x4be   : > { %2979 = vmatmul.msk.bf16.gmra.mxu3 %vm1370_vm0, %v2214_v31 }
 0x4d4   : > { %v1960_v49 = vpop.xlane.xlu0 %1959 }
 0x4d5   : > { %3242 = vrcp.f32 %v1960_v49 }
 0x4db   : > { %v3243_v6 = vpop.eup %3242 }
 0x4dc   : > { %v1963_v47 = vpop.xlane.xlu1 %1962  ;;  %v2054_v37 = vmul.f32 %v3243_v6, %v4795_v18 }
 0x4dd   : > { %3244 = vrcp.f32 %v1963_v47 }
 0x4de   : > { %v2086_v30 = vpack.c.bf16 %v2054_v37, %v2054_v37 }
 0x4e0   : > { %v2288_v56 = vunpack.c.l.b16 %v2086_v30 }
 0x4e3   : > { %v3245_v7 = vpop.eup %3244 }
 0x4e4   : > { %v2055_v25 = vmul.f32 %v3245_v7, %v4801_v21 }
 0x4e6   : > { %v2087_v60 = vpack.c.bf16 %v2055_v25, %v2055_v25 }
 0x4e8   : > { %v2289_v57 = vunpack.c.l.b16 %v2087_v60 }
 0x4ea   : > { %v2296_v39 = vpack.c.b16 %v2289_v57, %v2288_v56 }
 0x4ec   : > { %2980 = vmatmul.msk.bf16.vlgmr.msra.gmra.mxu2 %vm1370_vm0, %v2296_v39 }
 0x4ed   : > { %v1984_v62 = vpop.xlane.xlu2 %1983 }
 0x4ef   : > { %v2167_v12 = vpop.f32.mrf.mxu2 }
 0x4f0   : > { %2442 = vst.msk [vmem:[%s4901_s6] sm:$0xff] %vm1370_vm0, %v2167_v12 }
 0x4f5   : > { %v1969_v18 = vpop.xlane.xlu2 %1968 }
 0x4f6   : > { %3246 = vrcp.f32 %v1969_v18 }
 0x4f7   : > { %v2169_v0 = vpop.f32.mrf.mxu2  ;;  %3248 = vrcp.f32 %v1984_v62 }
 0x4f8   : > { %2443 = vst.msk [vmem:[%s4901_s6 + $0x8] sm:$0xff] %vm1370_vm0, %v2169_v0 }
 0x4fc   : > { %v3247_v17 = vpop.eup %3246 }
 0x4fd   : > { %v1966_v21 = vpop.xlane.xlu1 %1965  ;;  %v3249_v9 = vpop.eup %3248  ;;  %v2057_v52 = vmul.f32 %v3247_v17, %v4819_v32 }
 0x4fe   : > { %3250 = vrcp.f32 %v1966_v21  ;;  %v1987_v8 = vpop.xlane.xlu0 %1986  ;;  %v2062_v35 = vmul.f32 %v3249_v9, %v4810_v58 }
 0x4ff   : > { %3252 = vrcp.f32 %v1987_v8  ;;  %v2172_v23 = vpop.f32.mrf.mxu2  ;;  %v2089_v15 = vpack.c.bf16 %v2057_v52, %v2057_v52 }
 0x500   : > { %2444 = vst.msk [vmem:[%s4901_s6 + $0x10] sm:$0xff] %vm1370_vm0, %v2172_v23  ;;  %v2094_v63 = vpack.c.bf16 %v2062_v35, %v2062_v35 }
 0x501   : > { %v2291_v32 = vunpack.c.l.b16 %v2089_v15 }
 0x502   : > { %v2373_v10 = vunpack.c.l.b16 %v2094_v63 }
 0x504   : > { %v3251_v50 = vpop.eup %3250 }
 0x505   : > { %v3253_v2 = vpop.eup %3252  ;;  %v2056_v54 = vmul.f32 %v3251_v50, %v4827_v33 }
 0x506   : > { %v2063_v22 = vmul.f32 %v3253_v2, %v4829_v14  ;;  %v1990_v59 = vpop.xlane.xlu0 %1989 }
 0x507   : > { %v2088_v4 = vpack.c.bf16 %v2056_v54, %v2056_v54  ;;  %3254 = vrcp.f32 %v1990_v59  ;;  %v2174_v45 = vpop.f32.mrf.mxu2 }
 0x508   : > { %v2095_v11 = vpack.c.bf16 %v2063_v22, %v2063_v22  ;;  %2445 = vst.msk [vmem:[%s4901_s6 + $0x18] sm:$0xff] %vm1370_vm0, %v2174_v45  ;;  %v2252_v58 = vpop.f32.mrf.mxu3 }
 0x509   : > { %v2290_v44 = vunpack.c.l.b16 %v2088_v4  ;;  %2450 = vst.msk [vmem:[%s4901_s6 + $0x40] sm:$0xff] %vm1370_vm0, %v2252_v58 }
 0x50a   : > { %v2374_v40 = vunpack.c.l.b16 %v2095_v11 }
 0x50b   : > { %v2297_v33 = vpack.c.b16 %v2291_v32, %v2290_v44 }
 0x50c   : > { %v2381_v34 = vpack.c.b16 %v2374_v40, %v2373_v10 }
 0x50d   : > { %v1993_v48 = vpop.xlane.xlu1 %1992  ;;  %2981 = vmatmul.msk.bf16.gmra.mxu2 %vm1370_vm0, %v2297_v33  ;;  %v3255_v14 = vpop.eup %3254 }
 0x50e   : > { %3256 = vrcp.f32 %v1993_v48  ;;  %2984 = vmatmul.msk.bf16.vlgmr.msra.gmra.mxu3 %vm1370_vm0, %v2381_v34  ;;  %v1975_v26 = vpop.xlane.xlu0 %1974  ;;  %v2064_v5 = vmul.f32 %v3255_v14, %v4837_v53 }
 0x50f   : > { %v2177_v55 = vpop.f32.mrf.mxu2  ;;  %3258 = vrcp.f32 %v1975_v26 }
 0x510   : > { %2446 = vst.msk [vmem:[%s4901_s6 + $0x20] sm:$0xff] %vm1370_vm0, %v2177_v55  ;;  %v2254_v41 = vpop.f32.mrf.mxu3  ;;  %v2096_v1 = vpack.c.bf16 %v2064_v5, %v2064_v5 }
 0x511   : > { %2451 = vst.msk [vmem:[%s4901_s6 + $0x48] sm:$0xff] %vm1370_vm0, %v2254_v41 }
 0x512   : > { %v2375_v31 = vunpack.c.l.b16 %v2096_v1 }
 0x514   : > { %v3257_v43 = vpop.eup %3256 }
 0x515   : > { %v2065_v42 = vmul.f32 %v3257_v43, %v4848_v29  ;;  %v1996_v38 = vpop.xlane.xlu1 %1995  ;;  %v1972_v24 = vpop.xlane.xlu2 %1971 }
 0x516   : > { %v3259_v46 = vpop.eup %3258  ;;  %3260 = vrcp.f32 %v1972_v24 }
 0x517   : > { %v2097_v51 = vpack.c.bf16 %v2065_v42, %v2065_v42  ;;  %v2179_v3 = vpop.f32.mrf.mxu2  ;;  %v2059_v49 = vmul.f32 %v3259_v46, %v4845_v20  ;;  %3262 = vrcp.f32 %v1996_v38 }
 0x518   : > { %2447 = vst.msk [vmem:[%s4901_s6 + $0x28] sm:$0xff] %vm1370_vm0, %v2179_v3 }
 0x519   : > { %v2376_v53 = vunpack.c.l.b16 %v2097_v51  ;;  %v2091_v37 = vpack.c.bf16 %v2059_v49, %v2059_v49 }
 0x51b   : > { %v2382_v47 = vpack.c.b16 %v2376_v53, %v2375_v31  ;;  %v2293_v60 = vunpack.c.l.b16 %v2091_v37 }
 0x51c   : > { %v3261_v6 = vpop.eup %3260 }
 0x51d   : > { %v2058_v7 = vmul.f32 %v3261_v6, %v4860_v28  ;;  %v3263_v20 = vpop.eup %3262 }
 0x51e   : > { %2985 = vmatmul.msk.bf16.gmra.mxu3 %vm1370_vm0, %v2382_v47  ;;  %v1981_v29 = vpop.xlane.xlu1 %1980  ;;  %v2066_v18 = vmul.f32 %v3263_v20, %v4854_v61 }
 0x51f   : > { %v2090_v30 = vpack.c.bf16 %v2058_v7, %v2058_v7  ;;  %3264 = vrcp.f32 %v1981_v29 }
 0x520   : > { %v2257_v25 = vpop.f32.mrf.mxu3  ;;  %v2098_v8 = vpack.c.bf16 %v2066_v18, %v2066_v18 }
 0x521   : > { %v2292_v56 = vunpack.c.l.b16 %v2090_v30  ;;  %2452 = vst.msk [vmem:[%s4901_s6 + $0x50] sm:$0xff] %vm1370_vm0, %v2257_v25 }
 0x522   : > { %v2377_v54 = vunpack.c.l.b16 %v2098_v8 }
 0x523   : > { %v2298_v57 = vpack.c.b16 %v2293_v60, %v2292_v56 }
 0x525   : > { %2982 = vmatmul.msk.bf16.gmra.mxu2 %vm1370_vm0, %v2298_v57  ;;  %v3265_v28 = vpop.eup %3264 }
 0x526   : > { %v1999_v39 = vpop.xlane.xlu2 %1998  ;;  %v2061_v0 = vmul.f32 %v3265_v28, %v4870_v13 }
 0x527   : > { %3266 = vrcp.f32 %v1999_v39  ;;  %v1978_v62 = vpop.xlane.xlu0 %1977 }
 0x528   : > { %3268 = vrcp.f32 %v1978_v62  ;;  %v2259_v12 = vpop.f32.mrf.mxu3  ;;  %v2093_v52 = vpack.c.bf16 %v2061_v0, %v2061_v0 }
 0x529   : > { %2453 = vst.msk [vmem:[%s4901_s6 + $0x58] sm:$0xff] %vm1370_vm0, %v2259_v12 }
 0x52a   : > { %v2295_v22 = vunpack.c.l.b16 %v2093_v52 }
 0x52d   : > { %v3267_v21 = vpop.eup %3266 }
 0x52e   : > { %v3269_v17 = vpop.eup %3268  ;;  %v2067_v9 = vmul.f32 %v3267_v21, %v4878_v19  ;;  %v2002_v23 = vpop.xlane.xlu2 %2001 }
 0x52f   : > { %v2060_v35 = vmul.f32 %v3269_v17, %v4880_v16  ;;  %3270 = vrcp.f32 %v2002_v23  ;;  %v2005_v50 = vpop.xlane.xlu0 %2004 }
 0x530   : > { %v2099_v2 = vpack.c.bf16 %v2067_v9, %v2067_v9  ;;  %3272 = vrcp.f32 %v2005_v50  ;;  %v2262_v15 = vpop.f32.mrf.mxu3 }
 0x531   : > { %v2092_v61 = vpack.c.bf16 %v2060_v35, %v2060_v35  ;;  %v2182_v13 = vpop.f32.mrf.mxu2  ;;  %2454 = vst.msk [vmem:[%s4901_s6 + $0x60] sm:$0xff] %vm1370_vm0, %v2262_v15 }
 0x532   : > { %v2378_v63 = vunpack.c.l.b16 %v2099_v2  ;;  %2448 = vst.msk [vmem:[%s4901_s6 + $0x30] sm:$0xff] %vm1370_vm0, %v2182_v13 }
 0x533   : > { %v2294_v19 = vunpack.c.l.b16 %v2092_v61 }
 0x534   : > { %v2383_v59 = vpack.c.b16 %v2378_v63, %v2377_v54 }
 0x535   : > { %v3271_v4 = vpop.eup %3270  ;;  %v2299_v16 = vpack.c.b16 %v2295_v22, %v2294_v19 }
 0x536   : > { %v3273_v11 = vpop.eup %3272  ;;  %2986 = vmatmul.msk.bf16.gmra.mxu3 %vm1370_vm0, %v2383_v59  ;;  %v2068_v45 = vmul.f32 %v3271_v4, %v4888_v27 }
 0x537   : > { %2983 = vmatmul.msk.bf16.gmra.mxu2 %vm1370_vm0, %v2299_v16  ;;  %v2069_v32 = vmul.f32 %v3273_v11, %v4890_v36 }
 0x538   : > { %v2264_v44 = vpop.f32.mrf.mxu3  ;;  %v2100_v10 = vpack.c.bf16 %v2068_v45, %v2068_v45 }
 0x539   : > { %v2184_v58 = vpop.f32.mrf.mxu2  ;;  %2455 = vst.msk [vmem:[%s4901_s6 + $0x68] sm:$0xff] %vm1370_vm0, %v2264_v44  ;;  %v2101_v40 = vpack.c.bf16 %v2069_v32, %v2069_v32 }
 0x53a   : > { %2449 = vst.msk [vmem:[%s4901_s6 + $0x38] sm:$0xff] %vm1370_vm0, %v2184_v58  ;;  %v2379_v33 = vunpack.c.l.b16 %v2100_v10 }
 0x53b   : > { %v2380_v34 = vunpack.c.l.b16 %v2101_v40 }
 0x53d   : > { %v2384_v27 = vpack.c.b16 %v2380_v34, %v2379_v33 }
 0x541   : > { %v2267_v48 = vpop.f32.mrf.mxu3 }
 0x542   : > { %2456 = vst.msk [vmem:[%s4901_s6 + $0x70] sm:$0xff] %vm1370_vm0, %v2267_v48 }
 0x546   : > { %2987 = vmatmul.msk.bf16.gmra.mxu3 %vm1370_vm0, %v2384_v27 }
 0x549   : > { %v2269_v36 = vpop.f32.mrf.mxu3 }
 0x54a   : > { %2457 = vst.msk [vmem:[%s4901_s6 + $0x78] sm:$0xff] %vm1370_vm0, %v2269_v36 }
 0x56f   : > { %v2337_v14 = vpop.f32.mrf.mxu2 }
 0x570   : > { %2458 = vst.msk [vmem:[%s4901_s6 + $0x80] sm:$0xff] %vm1370_vm0, %v2337_v14 }
 0x577   : > { %v2339_v26 = vpop.f32.mrf.mxu2 }
 0x578   : > { %2459 = vst.msk [vmem:[%s4901_s6 + $0x88] sm:$0xff] %vm1370_vm0, %v2339_v26 }
 0x590   : > { %v2342_v55 = vpop.f32.mrf.mxu2 }
 0x591   : > { %2460 = vst.msk [vmem:[%s4901_s6 + $0x90] sm:$0xff] %vm1370_vm0, %v2342_v55  ;;  %v2422_v5 = vpop.f32.mrf.mxu3 }
 0x592   : > { %2466 = vst.msk [vmem:[%s4901_s6 + $0xc0] sm:$0xff] %vm1370_vm0, %v2422_v5 }
 0x598   : > { %v2344_v41 = vpop.f32.mrf.mxu2 }
 0x599   : > { %2461 = vst.msk [vmem:[%s4901_s6 + $0x98] sm:$0xff] %vm1370_vm0, %v2344_v41  ;;  %v2424_v43 = vpop.f32.mrf.mxu3 }
 0x59a   : > { %2467 = vst.msk [vmem:[%s4901_s6 + $0xc8] sm:$0xff] %vm1370_vm0, %v2424_v43 }
 0x5a1   : > { %v2427_v1 = vpop.f32.mrf.mxu3 }
 0x5a2   : > { %2468 = vst.msk [vmem:[%s4901_s6 + $0xd0] sm:$0xff] %vm1370_vm0, %v2427_v1 }
 0x5a8   : > { %v2347_v42 = vpop.f32.mrf.mxu2 }
 0x5a9   : > { %v2429_v38 = vpop.f32.mrf.mxu3  ;;  %2462 = vst.msk [vmem:[%s4901_s6 + $0xa0] sm:$0xff] %vm1370_vm0, %v2347_v42 }
 0x5aa   : > { %2469 = vst.msk [vmem:[%s4901_s6 + $0xd8] sm:$0xff] %vm1370_vm0, %v2429_v38 }
 0x5b0   : > { %v2349_v24 = vpop.f32.mrf.mxu2 }
 0x5b1   : > { %2463 = vst.msk [vmem:[%s4901_s6 + $0xa8] sm:$0xff] %vm1370_vm0, %v2349_v24 }
 0x5b9   : > { %v2432_v46 = vpop.f32.mrf.mxu3 }
 0x5ba   : > { %v2352_v51 = vpop.f32.mrf.mxu2  ;;  %2470 = vst.msk [vmem:[%s4901_s6 + $0xe0] sm:$0xff] %vm1370_vm0, %v2432_v46 }
 0x5bb   : > { %2464 = vst.msk [vmem:[%s4901_s6 + $0xb0] sm:$0xff] %vm1370_vm0, %v2352_v51 }
 0x5c1   : > { %v2434_v3 = vpop.f32.mrf.mxu3 }
 0x5c2   : > { %v2354_v31 = vpop.f32.mrf.mxu2  ;;  %2471 = vst.msk [vmem:[%s4901_s6 + $0xe8] sm:$0xff] %vm1370_vm0, %v2434_v3 }
 0x5c3   : > { %2465 = vst.msk [vmem:[%s4901_s6 + $0xb8] sm:$0xff] %vm1370_vm0, %v2354_v31 }
 0x5c9   : > { %v2437_v53 = vpop.f32.mrf.mxu3 }
 0x5ca   : > { %2472 = vst.msk [vmem:[%s4901_s6 + $0xf0] sm:$0xff] %vm1370_vm0, %v2437_v53 }
 0x5d1   : > { %v2439_v49 = vpop.f32.mrf.mxu3 }
 0x5d2   : > { %2473 = vst.msk [vmem:[%s4901_s6 + $0xf8] sm:$0xff] %vm1370_vm0, %v2439_v49 }
 0x5d3   : > { %3331 = shalt.err (!%p3328_p7)
}
 0x5d4   : > { %s3375_s24 = smov 128   ;;  %s3376_s3 = smov 8  }
 0x5d5   : > { %3097 = dma.vmem_to_hbm [thread:$0]  (%p3438_p11), %s2489_s16, 4096, %s2491_s17, %s2475_s22, %s3375_s24, %s3375_s24, %s3376_s3  }
 0x5d6 PF: > { %s2505_s4 = sand.u32 1, %s3358_s9   ;;  %p3104_p8 = pnand %p2566_p9, %p3442_p12 }
 0x5d7   : > { %s2506_s27 = scalar_lea.sflag [#allocation4], %s2505_s4 }
 0x5d8   : > { %p3105_p10 = pneg %p3104_p8 }
 0x5da   : > { %3353 = dma.done.wait (%p3105_p10), %s2506_s27, 4096  }
 0x5db   : > { %3355 = vsyncadd (%p3105_p10), %s2506_s27, 4294963200  ;;  %p15_p0 = scmp.ge.s32.totalorder %s3417_s15, 4   ;;  %s5099_s9 = smov %s3362_s10 }
 0x5dc   : > { %s5100_s10 = smov %s3366_s11  ;;  %s5101_s11 = smov %s3429_s18 }
 0x5dd   : > { %s5102_s12 = smov %s3417_s15  ;;  %17 = sbr.rel (!%p15_p0) target bundleno = 5 (0x5), region = 73 }
 0x5e2   :  { %2512 = vsyncpa [#allocation3], 1 }
 0x5e3   :  { %2514 = vsyncpa [#allocation3 + $0x1], 1 }
 0x5e4   :  { %2515 = vsyncpa [#allocation4], 1 }
 0x5e5   :  { %2517 = vsyncpa [#allocation4 + $0x1], 1 }

</bundles_post_ra>
